<compile_context>
chip_gen: v5e
topology: v5e:2x2
jax: 0.10.0
libtpu: 0.0.40
codegen_flags: <defaults>
</compile_context>

<pallas_src>
import numpy as np
import jax
import jax.numpy as jnp
from jax.experimental import pallas as pl
from jax.experimental.pallas import tpu as pltpu

# Keep the kernel and the pure-JAX reference numerically comparable at ~1e-5
# (TPU f32 matmuls otherwise default to reduced-precision MXU passes).
jax.config.update("jax_default_matmul_precision", "highest")

STATE_DIM = 4
CONTROL_DIM = 3
HIDDEN = 32                                    # H
IN_DIM = CONTROL_DIM + STATE_DIM + 1           # control + state + dt = 8
BATCH = 8
SEQ = 8


# --------------------------------------------------------------------------
# Kernel
# --------------------------------------------------------------------------
def base_lstm_kernel(x_ref, s0_ref, w_rec_ref, w_in_ref, bias_ref,
                     out_ref, state_scr):
    H = HIDDEN
    t = pl.program_id(0)

    # Step 0: load caller-provided initial recurrent state into the VMEM carry
    # (persists across the sequential "arbitrary" grid axis).
    @pl.when(t == 0)
    def _():
        state_scr[...] = s0_ref[...]

    s_prev = state_scr[...]                    # (B, 4H) = [h1 | c1 | h2 | c2]
    x = x_ref[...]                             # (B, IN_DIM) = [U | state | dt]
    B = x.shape[0]

    # Both recurrent matmuls in ONE MXU op. w_rec is (4H, 8H) with
    #   rows 0:H   , cols 0:4H  = W_hh1  (picks h1_prev)
    #   rows 2H:3H , cols 4H:8H = W_hh2  (picks h2_prev)
    # so the packed state multiplies it directly; zero rows kill c1/c2/h-cross
    # terms exactly (no lane shuffles needed).
    rec = jnp.dot(s_prev, w_rec_ref[...], preferred_element_type=jnp.float32)

    b1 = bias_ref[0:1, :]
    b2 = bias_ref[1:2, :]
    bfc1 = bias_ref[2:3, 0:H]
    wfc2 = bias_ref[3:4, 0:H]
    bfc2 = bias_ref[4:5, 0:1]

    def cell(gates, c_prev):
        # g-gate columns of W/b were pre-scaled by 2 at pack time, so a single
        # full-vreg sigmoid + the identity tanh(z) = 2*sigmoid(2z) - 1 covers
        # all four gates (1 EUP transcendental instead of 2).
        act = jax.nn.sigmoid(gates)
        i = act[:, 0:H]
        f = act[:, H:2 * H]
        g = 2.0 * act[:, 2 * H:3 * H] - 1.0
        o = act[:, 3 * H:4 * H]
        c = f * c_prev + i * g
        h = o * jnp.tanh(c)
        return h, c

    c1_prev = s_prev[:, H:2 * H]
    c2_prev = s_prev[:, 3 * H:4 * H]

    # ---- LSTM layer 1 (single merged input operand) ----
    g1 = (jnp.dot(x, w_in_ref[0:IN_DIM, :], preferred_element_type=jnp.float32)
          + rec[:, 0:4 * H] + b1)
    h1, c1 = cell(g1, c1_prev)

    # ---- LSTM layer 2 ----
    g2 = (jnp.dot(h1, w_in_ref[IN_DIM:IN_DIM + H, :],
                  preferred_element_type=jnp.float32)
          + rec[:, 4 * H:8 * H] + b2)
    h2, c2 = cell(g2, c2_prev)

    # ---- fc head: Linear(H,H) -> tanh -> Linear(H,1) ----
    y1 = jnp.tanh(
        jnp.dot(h2, w_in_ref[IN_DIM + H:IN_DIM + 2 * H, 0:H],
                preferred_element_type=jnp.float32) + bfc1)
    # (H,1) projection as a VPU multiply + lane reduction; bfc2 lives in the
    # bias slab (no extra operand).
    pred = jnp.sum(y1 * wfc2, axis=-1, keepdims=True) + bfc2        # (B, 1)

    packed = jnp.concatenate([h1, c1, h2, c2], axis=1)              # (B, 4H)
    state_scr[...] = packed                                          # carry

    # One lane-dense (B, 8H) output per step: lanes 0:4H = new recurrent state,
    # lanes 4H:8H = prediction broadcast (wrapper slices it back out).
    out_ref[...] = jnp.concatenate(
        [packed, jnp.broadcast_to(pred, (B, 4 * H))], axis=1)


# --------------------------------------------------------------------------
# Parameter init / packing
# --------------------------------------------------------------------------
def init_params(key):
    """PyTorch-style uniform(-1/sqrt(H), 1/sqrt(H)) init."""
    H = HIDDEN
    ks = jax.random.split(key, 12)
    k = 1.0 / np.sqrt(H)

    def u(kk, shape, bound):
        return jax.random.uniform(kk, shape, jnp.float32, -bound, bound)

    return {
        "wih1": u(ks[0], (IN_DIM, 4 * H), k),
        "whh1": u(ks[1], (H, 4 * H), k),
        "b1":   u(ks[2], (1, 4 * H), k) + u(ks[3], (1, 4 * H), k),   # b_ih + b_hh
        "wih2": u(ks[4], (H, 4 * H), k),
        "whh2": u(ks[5], (H, 4 * H), k),
        "b2":   u(ks[6], (1, 4 * H), k) + u(ks[7], (1, 4 * H), k),
        "wfc1": u(ks[8], (H, H), k),
        "bfc1": u(ks[9], (1, H), k),
        "wfc2": u(ks[10], (H, 1), k),
        "bfc2": u(ks[11], (1, 1), k),
    }


def _scale_g_cols(w):
    """Pre-scale g-gate columns by 2 (for the tanh(z)=2*sigmoid(2z)-1 trick)."""
    H = HIDDEN
    return w.at[..., 2 * H:3 * H].multiply(2.0)


def pack_params(params):
    """One-time packing into lane-dense slabs (outside the per-call path)."""
    H = HIDDEN

    # Recurrent slab (4H, 8H): rows aligned to the packed state [h1|c1|h2|c2].
    w_rec = jnp.zeros((4 * H, 8 * H), jnp.float32)
    w_rec = w_rec.at[0:H, 0:4 * H].set(_scale_g_cols(params["whh1"]))
    w_rec = w_rec.at[2 * H:3 * H, 4 * H:8 * H].set(_scale_g_cols(params["whh2"]))

    # Input / fc slab (IN_DIM + 2H, 4H) = (72, 128): W_ih1 | W_ih2 | W_fc1.
    w_in = jnp.zeros((IN_DIM + 2 * H, 4 * H), jnp.float32)
    w_in = w_in.at[0:IN_DIM, :].set(_scale_g_cols(params["wih1"]))
    w_in = w_in.at[IN_DIM:IN_DIM + H, :].set(_scale_g_cols(params["wih2"]))
    w_in = w_in.at[IN_DIM + H:IN_DIM + 2 * H, 0:H].set(params["wfc1"])

    # Bias slab (8, 4H): b1 | b2 | b_fc1 | w_fc2 row | b_fc2 scalar.
    bias = jnp.zeros((8, 4 * H), jnp.float32)
    bias = bias.at[0, :].set(_scale_g_cols(params["b1"][0]))
    bias = bias.at[1, :].set(_scale_g_cols(params["b2"][0]))
    bias = bias.at[2, 0:H].set(params["bfc1"][0])
    bias = bias.at[3, 0:H].set(params["wfc2"][:, 0])
    bias = bias.at[4, 0].set(params["bfc2"][0, 0])

    return {"w_rec": w_rec, "w_in": w_in, "bias": bias}


# --------------------------------------------------------------------------
# Wrappers
# --------------------------------------------------------------------------
def base_lstm_scan(x_seq, lstm_state, packed):
    """Runs T LSTM steps in ONE pallas_call (weights stay VMEM-resident).

    x_seq:      (T, B, IN_DIM) per-step [U | state | dt] inputs.
    lstm_state: (B, 4H) packed [h1|c1|h2|c2], or None for zeros (first call).
    Returns (preds (T, B, 1), new packed lstm state (B, 4H)).
    """
    T, B, _ = x_seq.shape
    H = HIDDEN
    if lstm_state is None:
        lstm_state = jnp.zeros((B, 4 * H), jnp.float32)
    x_seq = x_seq.astype(jnp.float32)
    lstm_state = lstm_state.astype(jnp.float32)

    out = pl.pallas_call(
        base_lstm_kernel,
        out_shape=jax.ShapeDtypeStruct((T, B, 8 * H), jnp.float32),
        grid=(T,),
        in_specs=[
            pl.BlockSpec((None, B, IN_DIM), lambda t: (t, 0, 0)),      # per-step x
            pl.BlockSpec((B, 4 * H), lambda t: (0, 0)),                # init state (resident)
            pl.BlockSpec((4 * H, 8 * H), lambda t: (0, 0)),            # W_hh slab (resident)
            pl.BlockSpec((IN_DIM + 2 * H, 4 * H), lambda t: (0, 0)),   # W_ih/W_fc slab (resident)
            pl.BlockSpec((8, 4 * H), lambda t: (0, 0)),                # bias slab (resident)
        ],
        out_specs=pl.BlockSpec((None, B, 8 * H), lambda t: (t, 0, 0)),
        scratch_shapes=[pltpu.VMEM((B, 4 * H), jnp.float32)],          # h/c carry
        compiler_params=pltpu.CompilerParams(
            dimension_semantics=("arbitrary",)),                        # sequential recurrence
    )(x_seq, lstm_state, packed["w_rec"], packed["w_in"], packed["bias"])

    preds = out[:, :, 4 * H:4 * H + 1]        # (T, B, 1)
    new_state = out[T - 1, :, 0:4 * H]        # (B, 4H)
    return preds, new_state


def base_lstm_step(state, dt, U, packed, lstm_state=None):
    """One BaseLSTM.forward() call. Returns (pred (B,1), new packed state)."""
    if state is None:
        lstm_state = None
        state = jnp.zeros((STATE_DIM,), jnp.float32)
    u = jnp.asarray(U, jnp.float32).reshape(-1, CONTROL_DIM)
    B = u.shape[0]
    x = jnp.concatenate(
        [u,
         jnp.broadcast_to(jnp.asarray(state, jnp.float32).reshape(1, STATE_DIM),
                          (B, STATE_DIM)),
         jnp.asarray(dt, jnp.float32).reshape(-1, 1)], axis=1)
    preds, new_state = base_lstm_scan(x[None], lstm_state, packed)
    return preds[0], new_state


def base_lstm_forward(state, state_var, dt, U, packed, lstm_state=None):
    """Mirrors BaseLSTM.forward(state, state_var, dt, U) -> (prediction, None).
    The updated recurrent state (PyTorch caches it in self.lstm_state) is
    available from base_lstm_step for the caller to feed back next call."""
    pred, _ = base_lstm_step(state, dt, U, packed, lstm_state)
    return pred, None


# --------------------------------------------------------------------------
# Pure-JAX reference (independent of the packed slabs / sigmoid trick)
# --------------------------------------------------------------------------
def _reference_scan(x_seq, params):
    H = HIDDEN
    T, B, _ = x_seq.shape
    h1 = jnp.zeros((B, H), jnp.float32)
    c1 = jnp.zeros((B, H), jnp.float32)
    h2 = jnp.zeros((B, H), jnp.float32)
    c2 = jnp.zeros((B, H), jnp.float32)

    def cell(xin, h_prev, c_prev, w_ih, w_hh, b):
        g = xin @ w_ih + h_prev @ w_hh + b
        i = jax.nn.sigmoid(g[:, :H])
        f = jax.nn.sigmoid(g[:, H:2 * H])
        gg = jnp.tanh(g[:, 2 * H:3 * H])
        o = jax.nn.sigmoid(g[:, 3 * H:])
        c = f * c_prev + i * gg
        return o * jnp.tanh(c), c

    preds = []
    for t in range(T):
        x = x_seq[t]
        h1, c1 = cell(x, h1, c1, params["wih1"], params["whh1"], params["b1"])
        h2, c2 = cell(h1, h2, c2, params["wih2"], params["whh2"], params["b2"])
        y1 = jnp.tanh(h2 @ params["wfc1"] + params["bfc1"])
        preds.append(y1 @ params["wfc2"] + params["bfc2"])
    state = jnp.concatenate([h1, c1, h2, c2], axis=1)
    return jnp.stack(preds), state


# --------------------------------------------------------------------------
if __name__ == "__main__":
    key = jax.random.PRNGKey(0)
    kp, ku, ks = jax.random.split(key, 3)

    params = init_params(kp)
    packed = pack_params(params)

    T, B = SEQ, BATCH
    U_seq = jax.random.normal(ku, (T, B, CONTROL_DIM), jnp.float32)
    state = jax.random.normal(ks, (STATE_DIM,), jnp.float32)
    dt = jnp.full((B,), 0.01, jnp.float32)

    # Per-step kernel input: one merged [U | state | dt] operand.
    x_seq = jnp.concatenate(
        [U_seq,
         jnp.broadcast_to(state.reshape(1, 1, STATE_DIM), (T, B, STATE_DIM)),
         jnp.broadcast_to(dt.reshape(1, B, 1), (T, B, 1))], axis=2)

    # --- multi-step path: T timesteps per pallas_call, weights resident ---
    preds, new_state = base_lstm_scan(x_seq, None, packed)
    preds = jax.block_until_ready(preds)
    new_state = jax.block_until_ready(new_state)

    ref_preds, ref_state = _reference_scan(x_seq, params)
    np.testing.assert_allclose(np.asarray(preds), np.asarray(ref_preds),
                               rtol=2e-5, atol=2e-5)
    np.testing.assert_allclose(np.asarray(new_state), np.asarray(ref_state),
                               rtol=2e-5, atol=2e-5)

    # --- single-step forward() semantics: state cached and fed back ---
    pred0, s1 = base_lstm_step(state, dt, U_seq[0], packed, lstm_state=None)
    pred1, s2 = base_lstm_step(state, dt, U_seq[1], packed, lstm_state=s1)
    pred1 = jax.block_until_ready(pred1)
    np.testing.assert_allclose(np.asarray(jnp.stack([pred0, pred1])),
                               np.asarray(ref_preds[:2]), rtol=2e-5, atol=2e-5)

    out, none_state = base_lstm_forward(state, None, dt, U_seq[0], packed)
    out = jax.block_until_ready(out)
    assert out.shape == (B, 1) and none_state is None

    print("KERNEL_OK")
</pallas_src>

<mosaic_0001>
module attributes {stable_mosaic.version = 11 : i64} {
  func.func @base_lstm_kernel(%arg0: i32, %arg1: memref<1x8x8xf32, #tpu.memory_space<vmem>>, %arg2: memref<8x128xf32, #tpu.memory_space<vmem>>, %arg3: memref<128x256xf32, #tpu.memory_space<vmem>>, %arg4: memref<72x128xf32, #tpu.memory_space<vmem>>, %arg5: memref<8x128xf32, #tpu.memory_space<vmem>>, %arg6: memref<1x8x256xf32, #tpu.memory_space<vmem>>, %arg7: memref<8x128xf32, #tpu.memory_space<vmem>>) attributes {dimension_semantics = [#tpu.dimension_semantics<arbitrary>], iteration_bounds = array<i64: 8>, scalar_prefetch = 0 : i64, scratch_operands = 1 : i64, tpu.core_type = #tpu.core_type<tc>, window_params = [{transform_indices = @transform_0, window_bounds = array<i64: 1, 8, 8>}, {pipeline_mode = #tpu.pipeline_mode<synchronous>, transform_indices = @transform_1, window_bounds = array<i64: 8, 128>}, {pipeline_mode = #tpu.pipeline_mode<synchronous>, transform_indices = @transform_2, window_bounds = array<i64: 128, 256>}, {pipeline_mode = #tpu.pipeline_mode<synchronous>, transform_indices = @transform_3, window_bounds = array<i64: 72, 128>}, {pipeline_mode = #tpu.pipeline_mode<synchronous>, transform_indices = @transform_4, window_bounds = array<i64: 8, 128>}, {transform_indices = @transform_5, window_bounds = array<i64: 1, 8, 256>}]} {
    %c0_i32 = arith.constant 0 : i32
    %0 = arith.cmpi eq, %arg0, %c0_i32 : i32
    %1 = arith.extui %0 : i1 to i32
    %c0_i32_0 = arith.constant 0 : i32
    %2 = arith.cmpi ne, %1, %c0_i32_0 : i32
    scf.if %2 {
      %c0_32 = arith.constant 0 : index
      %c0_33 = arith.constant 0 : index
      %82 = vector.load %arg2[%c0_32, %c0_33] : memref<8x128xf32, #tpu.memory_space<vmem>>, vector<8x128xf32>
      %c0_34 = arith.constant 0 : index
      %c0_35 = arith.constant 0 : index
      %83 = vector.load %arg7[%c0_34, %c0_35] : memref<8x128xf32, #tpu.memory_space<vmem>>, vector<8x128xf32>
      tpu.vector_store %arg7[%c0_34, %c0_35], %82 {strides = array<i32>} : memref<8x128xf32, #tpu.memory_space<vmem>>, vector<8x128xf32>,
    } else {
    }
    %c0 = arith.constant 0 : index
    %c0_1 = arith.constant 0 : index
    %3 = vector.load %arg7[%c0, %c0_1] : memref<8x128xf32, #tpu.memory_space<vmem>>, vector<8x128xf32>
    %c0_2 = arith.constant 0 : index
    %c0_3 = arith.constant 0 : index
    %c0_4 = arith.constant 0 : index
    %4 = vector.load %arg1[%c0_2, %c0_3, %c0_4] : memref<1x8x8xf32, #tpu.memory_space<vmem>>, vector<1x8x8xf32>
    %5 = vector.shape_cast %4 : vector<1x8x8xf32> to vector<8x8xf32>
    %c0_5 = arith.constant 0 : index
    %c0_6 = arith.constant 0 : index
    %6 = vector.load %arg3[%c0_5, %c0_6] : memref<128x256xf32, #tpu.memory_space<vmem>>, vector<128x256xf32>
    %cst = arith.constant dense<0.000000e+00> : vector<8x256xf32>
    %7 = tpu.matmul %3, %6, %cst {dimension_numbers = #tpu.dot_dimension_numbers<[1], [0], [0], [1], [0, 0, 1, 1], [], []>, precision = #tpu.contract_precision<fp32>} : vector<8x128xf32>, vector<128x256xf32>, vector<8x256xf32> -> vector<8x256xf32>
    %c0_7 = arith.constant 0 : index
    %c0_8 = arith.constant 0 : index
    %8 = vector.load %arg5[%c0_7, %c0_8] : memref<8x128xf32, #tpu.memory_space<vmem>>, vector<1x128xf32>
    %c1 = arith.constant 1 : index
    %c0_9 = arith.constant 0 : index
    %9 = vector.load %arg5[%c1, %c0_9] : memref<8x128xf32, #tpu.memory_space<vmem>>, vector<1x128xf32>
    %c2 = arith.constant 2 : index
    %c0_10 = arith.constant 0 : index
    %10 = vector.load %arg5[%c2, %c0_10] : memref<8x128xf32, #tpu.memory_space<vmem>>, vector<1x32xf32>
    %c3 = arith.constant 3 : index
    %c0_11 = arith.constant 0 : index
    %11 = vector.load %arg5[%c3, %c0_11] : memref<8x128xf32, #tpu.memory_space<vmem>>, vector<1x32xf32>
    %c4 = arith.constant 4 : index
    %c0_12 = arith.constant 0 : index
    %12 = vector.load %arg5[%c4, %c0_12] : memref<8x128xf32, #tpu.memory_space<vmem>>, vector<1x1xf32>
    %13 = vector.extract_strided_slice %3 {offsets = [0, 32], sizes = [8, 32], strides = [1, 1]} : vector<8x128xf32> to vector<8x32xf32>
    %14 = vector.extract_strided_slice %3 {offsets = [0, 96], sizes = [8, 32], strides = [1, 1]} : vector<8x128xf32> to vector<8x32xf32>
    %c0_13 = arith.constant 0 : index
    %c0_14 = arith.constant 0 : index
    %15 = vector.load %arg4[%c0_13, %c0_14] : memref<72x128xf32, #tpu.memory_space<vmem>>, vector<8x128xf32>
    %cst_15 = arith.constant dense<0.000000e+00> : vector<8x128xf32>
    %16 = tpu.matmul %5, %15, %cst_15 {dimension_numbers = #tpu.dot_dimension_numbers<[1], [0], [0], [1], [0, 0, 1, 1], [], []>, precision = #tpu.contract_precision<fp32>} : vector<8x8xf32>, vector<8x128xf32>, vector<8x128xf32> -> vector<8x128xf32>
    %17 = vector.extract_strided_slice %7 {offsets = [0, 0], sizes = [8, 128], strides = [1, 1]} : vector<8x256xf32> to vector<8x128xf32>
    %18 = arith.addf %16, %17 : vector<8x128xf32>
    %19 = vector.broadcast %8 : vector<1x128xf32> to vector<8x128xf32>
    %20 = arith.addf %18, %19 : vector<8x128xf32>
    %21 = arith.negf %20 : vector<8x128xf32>
    %22 = math.exp %21 : vector<8x128xf32>
    %cst_16 = arith.constant 1.000000e+00 : f32
    %23 = vector.broadcast %cst_16 : f32 to vector<8x128xf32>
    %24 = arith.addf %23, %22 : vector<8x128xf32>
    %25 = arith.divf %23, %24 : vector<8x128xf32>
    %26 = vector.extract_strided_slice %25 {offsets = [0, 0], sizes = [8, 32], strides = [1, 1]} : vector<8x128xf32> to vector<8x32xf32>
    %27 = vector.extract_strided_slice %25 {offsets = [0, 32], sizes = [8, 32], strides = [1, 1]} : vector<8x128xf32> to vector<8x32xf32>
    %28 = vector.extract_strided_slice %25 {offsets = [0, 64], sizes = [8, 32], strides = [1, 1]} : vector<8x128xf32> to vector<8x32xf32>
    %cst_17 = arith.constant 2.000000e+00 : f32
    %29 = vector.broadcast %cst_17 : f32 to vector<8x32xf32>
    %30 = arith.mulf %29, %28 : vector<8x32xf32>
    %cst_18 = arith.constant 1.000000e+00 : f32
    %31 = vector.broadcast %cst_18 : f32 to vector<8x32xf32>
    %32 = arith.subf %30, %31 : vector<8x32xf32>
    %33 = vector.extract_strided_slice %25 {offsets = [0, 96], sizes = [8, 32], strides = [1, 1]} : vector<8x128xf32> to vector<8x32xf32>
    %34 = arith.mulf %27, %13 : vector<8x32xf32>
    %35 = arith.mulf %26, %32 : vector<8x32xf32>
    %36 = arith.addf %34, %35 : vector<8x32xf32>
    %37 = math.tanh %36 : vector<8x32xf32>
    %38 = arith.mulf %33, %37 : vector<8x32xf32>
    %c8 = arith.constant 8 : index
    %c0_19 = arith.constant 0 : index
    %39 = vector.load %arg4[%c8, %c0_19] : memref<72x128xf32, #tpu.memory_space<vmem>>, vector<32x128xf32>
    %cst_20 = arith.constant dense<0.000000e+00> : vector<8x128xf32>
    %40 = tpu.matmul %38, %39, %cst_20 {dimension_numbers = #tpu.dot_dimension_numbers<[1], [0], [0], [1], [0, 0, 1, 1], [], []>, precision = #tpu.contract_precision<fp32>} : vector<8x32xf32>, vector<32x128xf32>, vector<8x128xf32> -> vector<8x128xf32>
    %41 = vector.extract_strided_slice %7 {offsets = [0, 128], sizes = [8, 128], strides = [1, 1]} : vector<8x256xf32> to vector<8x128xf32>
    %42 = arith.addf %40, %41 : vector<8x128xf32>
    %43 = vector.broadcast %9 : vector<1x128xf32> to vector<8x128xf32>
    %44 = arith.addf %42, %43 : vector<8x128xf32>
    %45 = arith.negf %44 : vector<8x128xf32>
    %46 = math.exp %45 : vector<8x128xf32>
    %cst_21 = arith.constant 1.000000e+00 : f32
    %47 = vector.broadcast %cst_21 : f32 to vector<8x128xf32>
    %48 = arith.addf %47, %46 : vector<8x128xf32>
    %49 = arith.divf %47, %48 : vector<8x128xf32>
    %50 = vector.extract_strided_slice %49 {offsets = [0, 0], sizes = [8, 32], strides = [1, 1]} : vector<8x128xf32> to vector<8x32xf32>
    %51 = vector.extract_strided_slice %49 {offsets = [0, 32], sizes = [8, 32], strides = [1, 1]} : vector<8x128xf32> to vector<8x32xf32>
    %52 = vector.extract_strided_slice %49 {offsets = [0, 64], sizes = [8, 32], strides = [1, 1]} : vector<8x128xf32> to vector<8x32xf32>
    %cst_22 = arith.constant 2.000000e+00 : f32
    %53 = vector.broadcast %cst_22 : f32 to vector<8x32xf32>
    %54 = arith.mulf %53, %52 : vector<8x32xf32>
    %cst_23 = arith.constant 1.000000e+00 : f32
    %55 = vector.broadcast %cst_23 : f32 to vector<8x32xf32>
    %56 = arith.subf %54, %55 : vector<8x32xf32>
    %57 = vector.extract_strided_slice %49 {offsets = [0, 96], sizes = [8, 32], strides = [1, 1]} : vector<8x128xf32> to vector<8x32xf32>
    %58 = arith.mulf %51, %14 : vector<8x32xf32>
    %59 = arith.mulf %50, %56 : vector<8x32xf32>
    %60 = arith.addf %58, %59 : vector<8x32xf32>
    %61 = math.tanh %60 : vector<8x32xf32>
    %62 = arith.mulf %57, %61 : vector<8x32xf32>
    %c40 = arith.constant 40 : index
    %c0_24 = arith.constant 0 : index
    %63 = vector.load %arg4[%c40, %c0_24] : memref<72x128xf32, #tpu.memory_space<vmem>>, vector<32x32xf32>
    %cst_25 = arith.constant dense<0.000000e+00> : vector<8x32xf32>
    %64 = tpu.matmul %62, %63, %cst_25 {dimension_numbers = #tpu.dot_dimension_numbers<[1], [0], [0], [1], [0, 0, 1, 1], [], []>, precision = #tpu.contract_precision<fp32>} : vector<8x32xf32>, vector<32x32xf32>, vector<8x32xf32> -> vector<8x32xf32>
    %65 = vector.broadcast %10 : vector<1x32xf32> to vector<8x32xf32>
    %66 = arith.addf %64, %65 : vector<8x32xf32>
    %67 = math.tanh %66 : vector<8x32xf32>
    %68 = vector.broadcast %11 : vector<1x32xf32> to vector<8x32xf32>
    %69 = arith.mulf %67, %68 : vector<8x32xf32>
    %cst_26 = arith.constant dense<0.000000e+00> : vector<8xf32>
    %70 = vector.multi_reduction <add>, %69, %cst_26 [1] : vector<8x32xf32> to vector<8xf32>
    %71 = vector.shape_cast %70 : vector<8xf32> to vector<8x1xf32>
    %72 = vector.broadcast %12 : vector<1x1xf32> to vector<8x1xf32>
    %73 = arith.addf %71, %72 : vector<8x1xf32>
    %74 = tpu.concatenate %38, %36, %62, %60 in 1 : vector<8x32xf32>, vector<8x32xf32>, vector<8x32xf32>, vector<8x32xf32> -> vector<8x128xf32>
    %c0_27 = arith.constant 0 : index
    %c0_28 = arith.constant 0 : index
    %75 = vector.load %arg7[%c0_27, %c0_28] : memref<8x128xf32, #tpu.memory_space<vmem>>, vector<8x128xf32>
    tpu.vector_store %arg7[%c0_27, %c0_28], %74 {strides = array<i32>} : memref<8x128xf32, #tpu.memory_space<vmem>>, vector<8x128xf32>,
    %76 = vector.shape_cast %73 : vector<8x1xf32> to vector<8x1xf32>
    %77 = vector.broadcast %76 : vector<8x1xf32> to vector<8x128xf32>
    %78 = tpu.concatenate %74, %77 in 1 : vector<8x128xf32>, vector<8x128xf32> -> vector<8x256xf32>
    %c0_29 = arith.constant 0 : index
    %c0_30 = arith.constant 0 : index
    %c0_31 = arith.constant 0 : index
    %79 = vector.load %arg6[%c0_29, %c0_30, %c0_31] : memref<1x8x256xf32, #tpu.memory_space<vmem>>, vector<1x8x256xf32>
    %80 = vector.shape_cast %79 : vector<1x8x256xf32> to vector<8x256xf32>
    %81 = vector.shape_cast %78 : vector<8x256xf32> to vector<1x8x256xf32>
    tpu.vector_store %arg6[%c0_29, %c0_30, %c0_31], %81 {strides = array<i32>} : memref<1x8x256xf32, #tpu.memory_space<vmem>>, vector<1x8x256xf32>,
    return
  }
  func.func @transform_0(%arg0: i32) -> (i32, i32, i32) {
    %c0_i32 = arith.constant 0 : i32
    %c0_i32_0 = arith.constant 0 : i32
    %c0_i32_1 = arith.constant 0 : i32
    return %arg0, %c0_i32, %c0_i32_0 : i32, i32, i32
  }
  func.func @transform_1(%arg0: i32) -> (i32, i32) {
    %c0_i32 = arith.constant 0 : i32
    %c0_i32_0 = arith.constant 0 : i32
    %c0_i32_1 = arith.constant 0 : i32
    return %c0_i32, %c0_i32_0 : i32, i32
  }
  func.func @transform_2(%arg0: i32) -> (i32, i32) {
    %c0_i32 = arith.constant 0 : i32
    %c0_i32_0 = arith.constant 0 : i32
    %c0_i32_1 = arith.constant 0 : i32
    return %c0_i32, %c0_i32_0 : i32, i32
  }
  func.func @transform_3(%arg0: i32) -> (i32, i32) {
    %c0_i32 = arith.constant 0 : i32
    %c0_i32_0 = arith.constant 0 : i32
    %c0_i32_1 = arith.constant 0 : i32
    return %c0_i32, %c0_i32_0 : i32, i32
  }
  func.func @transform_4(%arg0: i32) -> (i32, i32) {
    %c0_i32 = arith.constant 0 : i32
    %c0_i32_0 = arith.constant 0 : i32
    %c0_i32_1 = arith.constant 0 : i32
    return %c0_i32, %c0_i32_0 : i32, i32
  }
  func.func @transform_5(%arg0: i32) -> (i32, i32, i32) {
    %c0_i32 = arith.constant 0 : i32
    %c0_i32_0 = arith.constant 0 : i32
    %c0_i32_1 = arith.constant 0 : i32
    return %arg0, %c0_i32, %c0_i32_0 : i32, i32, i32
  }
}

</mosaic_0001>

<bundles_post_ra>
// kernel: tpu_custom_call.1
= control target key start
LH: loop header
LB: loop body
LE: loop exit
PB: predicated region body
PF: predicated region fallthrough
CT: control target
= control target key end

     0   :  { %10 = vsyncpa [#allocation4], 0  ;;  %s2933_s0 = inlined_call_operand.hbm [shape: f32[8,8,8], index: 0, kind: input, shape index: {}]   ;;  %s2934_s1 = inlined_call_operand.hbm [shape: f32[8,128], index: 1, kind: input, shape index: {}]   ;;  %s2935_s2 = inlined_call_operand.hbm [shape: f32[128,256], index: 2, kind: input, shape index: {}]   ;;  %s2936_s3 = inlined_call_operand.hbm [shape: f32[72,128], index: 3, kind: input, shape index: {}]   ;;  %s2937_s4 = inlined_call_operand.hbm [shape: f32[8,128], index: 4, kind: input, shape index: {}]   ;;  %s2938_s5 = inlined_call_operand.hbm [shape: f32[8,8,256], index: 5, kind: output, shape index: {}]  }
   0x1   :  { %12 = vsyncpa [#allocation4 + $0x1], 0 }
   0x2   :  { %13 = vsyncpa [#allocation7], 0 }
   0x3   :  { %14 = vsyncpa [#allocation10], 0 }
   0x4   :  { %15 = vsyncpa [#allocation5], 0 }
   0x5   :  { %17 = vsyncpa [#allocation5 + $0x1], 0  ;;  %s2221_s18 = smov 0   ;;  %s2223_s19 = smov 0  }
   0x6   :  { %s2225_s20 = smov 0   ;;  %s2227_s21 = smov 0  }
   0x7 LB: > { %s176_s24 = sshll.u32 %s2934_s1, 4  ;;  %s2245_s25 = sadd.s32 4294967295, %s2177_s21   ;;  %s2177_s21 = sphi %s2227_s21, %s3005_s21   ;;  %s2173_s20 = sphi %s2225_s20, %s3004_s20   ;;  %s2169_s19 = sphi %s2223_s19, %s3003_s19   ;;  %s2165_s18 = sphi %s2221_s18, %s3002_s18   ;;  %s177_s24 = int_to_ptr.hbm [resolvable:$true] %s176_s24 }
   0x8   : > { %p1811_p0 = scmp.ge.s32.totalorder %s2177_s21, 1  ;;  %p44_p1 = scmp.eq.s32.totalorder %s2245_s25, 0 }
   0x9   : > { %p164_p2 = scmp.lt.s32.totalorder %s2177_s21, 9  ;;  %s2179_s27 = smov [#allocation6]  }
   0xa   : > { %s178_s28 = sshll.u32 %s2179_s27, 4  ;;  %s201_s6 = sshll.u32 %s2936_s3, 4  ;;  %s179_s28 = int_to_ptr.vmem [resolvable:$true] %s178_s28  ;;  %s202_s6 = int_to_ptr.hbm [resolvable:$true] %s201_s6 }
   0xb   : > { %p2251_p4 = pnand %p1811_p0, %p164_p2  ;;  %s2180_s8 = smov [#allocation9]  }
   0xc   : > { %s203_s9 = sshll.u32 %s2180_s8, 4  ;;  %s2181_s10 = smov 128   ;;  %s204_s9 = int_to_ptr.vmem [resolvable:$true] %s203_s9 }
   0xd   : > { %p1857_p5 = pneg %p2251_p4  ;;  %s2182_s11 = smov 8  }
   0xe   : > { %s187_s14 = sshll.u32 %s2935_s2, 4  ;;  %s2183_s15 = smov [#allocation8]   ;;  %s188_s14 = int_to_ptr.hbm [resolvable:$true] %s187_s14 }
   0xf   : > { %p2262_p6 = pnand %p1857_p5, %p44_p1  ;;  %s189_s16 = sshll.u32 %s2183_s15, 4  ;;  %s190_s16 = int_to_ptr.vmem [resolvable:$true] %s189_s16 }
  0x10   : > { %s216_s23 = sshll.u32 %s2937_s4, 4  ;;  %s2185_s27 = smov 16   ;;  %s217_s23 = int_to_ptr.hbm [resolvable:$true] %s216_s23 }
  0x11   : > { %1860 = dma.hbm_to_vmem [thread:$0]  (!%p2262_p6), %s177_s24, 128, %s179_s28, [#allocation7]  }
  0x12   : > { %1866 = dma.hbm_to_vmem [thread:$0]  (!%p2262_p6), %s202_s6, 1152, %s204_s9, [#allocation10], %s2181_s10, %s2181_s10, %s2182_s11  }
  0x13   : > { %s2184_s24 = smov 256   ;;  %s2186_s28 = smov [#allocation11]  }
  0x14   : > { %1863 = dma.hbm_to_vmem [thread:$0]  (!%p2262_p6), %s188_s14, 4096, %s190_s16, [#allocation7], %s2184_s24, %s2184_s24, %s2185_s27  }
  0x15   : > { %s218_s29 = sshll.u32 %s2186_s28, 4  ;;  %s1810_s30 = sadd.s32 4294967294, %s2177_s21   ;;  %s219_s29 = int_to_ptr.vmem [resolvable:$true] %s218_s29 }
  0x16   : > { %1869 = dma.hbm_to_vmem [thread:$0]  (!%p2262_p6), %s217_s23, 128, %s219_s29, [#allocation10]  }
  0x17   : > { %s2282_s6 = sadd.s32 1, %s2177_s21   ;;  %s30_s9 = sadd.s32 1, %s2173_s20 }
  0x18   : > { %s27_s8 = ssub.s32 %s2177_s21, %s2282_s6  ;;  %p37_p8 = scmp.ne.s32.totalorder %s2173_s20, %s2169_s19 }
  0x19   : > { %p28_p7 = scmp.eq.s32.totalorder %s27_s8, 0  ;;  %p38_p9 = scmp.eq.s32.totalorder %s2177_s21, 0 }
  0x1a   : > { %p43_p10 = scmp.ne.s32.totalorder %s2169_s19, %s2165_s18  ;;  %p151_p13 = scmp.eq.s32.totalorder %s2245_s25, 7 }
  0x1b   : > { %s2293_s10 = scalar_select %p28_p7, %s2173_s20, %s30_s9  }
  0x1c   : > { %p2295_p11 = por %p38_p9, %p37_p8  ;;  %p2301_p12 = por %p44_p1, %p43_p10 }
  0x1d   : > { %p157_p0 = scmp.eq.s32.totalorder %s1810_s30, 7  ;;  %p1882_p2 = scmp.lt.s32.totalorder %s2177_s21, 8 }
  0x1e   : > { %s229_s12 = sand.u32 1, %s2173_s20   ;;  %p2308_p5 = por %p151_p13, %p37_p8 }
  0x1f   : > { %p2312_p6 = por %p157_p0, %p43_p10  ;;  %s1817_s15 = sshll.u32 %s229_s12, 3 }
  0x20   : > { %s1818_s16 = sshll.u32 %s2177_s21, 3  ;;  %s233_s24 = scalar_lea.vmem [#allocation3], %s1817_s15 }
  0x21   : > { %s237_s23 = scalar_lea.hbm %s2933_s0, %s1818_s16  ;;  %s241_s27 = sshll.u32 %s233_s24, 4  ;;  %s242_s27 = int_to_ptr.vmem [resolvable:$true] %s241_s27 }
  0x22   : > { %s239_s28 = sshll.u32 %s237_s23, 4  ;;  %p2322_p7 = pnand %p1882_p2, %p2295_p11  ;;  %s240_s28 = int_to_ptr.hbm [resolvable:$true] %s239_s28 }
  0x23   : > { %s230_s30 = scalar_lea.sflag [#allocation4], %s229_s12  ;;  %s2073_s8 = sshra.s32 %s240_s28, 4  ;;  %s2074_s8 = int_to_ptr.hbm [resolvable:$true] %s2073_s8 }
  0x24   : > { %s2075_s9 = scalar_lea.hbm %s2074_s8, 8  ;;  %p2077_p9 = pneg %p2322_p7 }
  0x25   : > { %p2076_p8 = scmp.ne.s32.totalorder %s2074_s8, %s2075_s9  ;;  %s2080_s17 = scalar_lea.hbm %s2933_s0, 64 }
  0x26   : > { %p2081_p11 = scmp.lt.s32.totalorder %s2074_s8, %s2933_s0  ;;  %p2082_p0 = scmp.lt.s32.totalorder %s2080_s17, %s2075_s9 }
  0x27   : > { %p2078_p10 = pnand %p2077_p9, %p2076_p8 }
  0x28   : > { %p2083_p2 = por %p2082_p0, %p2081_p11 }
  0x29   : > { %p2079_p13 = pneg %p2078_p10 }
  0x2b   : > { %p2084_p3 = pnand %p2083_p2, %p2079_p13 }
  0x2d   : > { %2087 = shalt.err (!%p2084_p3)
}
  0x2e   : > { %1873 = dma.hbm_to_vmem [thread:$0]  (!%p2322_p7), %s240_s28, 128, %s242_s27, %s230_s30  }
  0x2f   : > { %250 = sbr.rel (%p2251_p4) target bundleno = 1838 (0x72e), region = 40 }
  0x34   : > { %s2339_s12 = sand.u32 1, %s2169_s19  }
  0x35   : > { %s1820_s23 = sshll.u32 %s2339_s12, 3  ;;  %s253_s24 = scalar_lea.sflag [#allocation4], %s2339_s12 }
  0x36   : > { %s2343_s15 = scalar_lea.vmem [#allocation3], %s1820_s23 }
  0x37   : > { %2148 = dma.done.wait (%p2301_p12), %s253_s24, 128  }
  0x38   : > { %2150 = vsyncadd (%p2301_p12), %s253_s24, 4294967168 }
  0x39   : > { %2152 = dma.done.wait (%p44_p1), [#allocation7], 4224  }
  0x3a   : > { %2154 = vsyncadd (%p44_p1), [#allocation7], 4294963072 }
  0x3b   : > { %2156 = dma.done.wait (%p44_p1), [#allocation10], 1280  }
  0x3c   : > { %2158 = vsyncadd (%p44_p1), [#allocation10], 4294966016  ;;  %s1825_s26 = sshll.u32 %s2339_s12, 4  ;;  %p2965_p3 = scmp.ne.s32.totalorder %s2245_s25, 0 }
  0x3d   : > { %s2358_s27 = scalar_lea.vmem [#allocation12], %s1825_s26 }
  0x3e   : > { %307 = sbr.rel (%p2965_p3) target bundleno = 69 (0x45), region = 64 }
  0x43   : > { %v308_v0 = vld [vmem:[#allocation6] sm:$0xff] }
  0x44   : > { %309 = vst [vmem:[#allocation2] sm:$0xff] %v308_v0 }
  0x45 PF: > { %v342_v1 = vld [vmem:[#allocation8 + $0xf0] sm:$0xff]  ;;  %v340_v2 = vld [vmem:[#allocation8 + $0xe0] sm:$0xff]  ;;  %v343_v60 = vld [vmem:[#allocation8 + $0xf8] sm:$0xff]  ;;  %vm1032_vm0 = vcmask 64512   ;;  %s2187_s7 = smov 64   ;;  %s2188_s28 = smov 32  }
  0x46   : > { %v338_v3 = vld [vmem:[#allocation8 + $0xd0] sm:$0xff]  ;;  %v2362_v4 = vand.u32 4294901760, %v342_v1  ;;  %v2364_v5 = vand.u32 4294901760, %v340_v2  ;;  %v336_v7 = vld [vmem:[#allocation8 + $0xc0] sm:$0xff]  ;;  %vm1229_vm5 = vcmask 261120   ;;  %s2189_s29 = smov 96  }
  0x47   : > { %v2366_v6 = vand.u32 4294901760, %v338_v3  ;;  %v334_v8 = vld [vmem:[#allocation8 + $0xb0] sm:$0xff]  ;;  %v332_v9 = vld [vmem:[#allocation8 + $0xa0] sm:$0xff]  ;;  %v2368_v10 = vand.u32 4294901760, %v336_v7  ;;  %vm1673_vm10 = vcmask 523264   ;;  %vm1675_vm11 = vcmask 785408  }
  0x48   : > { %v2370_v11 = vand.u32 4294901760, %v334_v8  ;;  %v2372_v12 = vand.u32 4294901760, %v332_v9  ;;  %v330_v13 = vld [vmem:[#allocation8 + $0x90] sm:$0xff]  ;;  %v328_v14 = vld [vmem:[#allocation8 + $0x80] sm:$0xff]  ;;  %345 = vmatpush.msra.mxu0 %v2362_v4  ;;  %v2376_v15 = vsub.f32 %v342_v1, %v2362_v4  ;;  %v2379_v16 = vsub.f32 %v340_v2, %v2364_v5  ;;  %541 = vmatpush.msra.mxu3 %v2362_v4  ;;  %s1836_s30 = sshll.u32 %s2245_s25, 4  ;;  %s1699_s17 = sshll.u32 %s2358_s27, 4  ;;  %s1700_s17 = int_to_ptr.vmem [resolvable:$true] %s1699_s17 }
  0x49   : > { %v2383_v17 = vsub.f32 %v338_v3, %v2366_v6  ;;  %v2385_v18 = vand.u32 4294901760, %v330_v13  ;;  %v326_v19 = vld [vmem:[#allocation8 + $0x70] sm:$0xff]  ;;  %v2388_v20 = vsub.f32 %v336_v7, %v2368_v10  ;;  %v2401_v26 = vand.u32 4294901760, %v328_v14  ;;  %v324_v27 = vld [vmem:[#allocation8 + $0x60] sm:$0xff]  ;;  %v341_v7 = vld [vmem:[#allocation8 + $0xe8] sm:$0xff]  ;;  %s1697_s16 = scalar_lea.hbm %s2938_s5, %s1836_s30  ;;  %s1686_s11 = scalar_lea.sflag [#allocation5], %s2339_s12 }
  0x4a   : > { %v2391_v21 = vsub.f32 %v334_v8, %v2370_v11  ;;  %v2394_v22 = vsub.f32 %v332_v9, %v2372_v12  ;;  %347 = vmatpush.msra.mxu0 %v2364_v5  ;;  %488 = vmatpush.msra.mxu2 %v2376_v15  ;;  %v387_v23 = vand.u32 4294901760, %v2376_v15  ;;  %v2954_v24 = vand.u32 4294901760, %v2379_v16  ;;  %v322_v35 = vld [vmem:[#allocation8 + $0x50] sm:$0xff]  ;;  %v320_v43 = vld [vmem:[#allocation8 + $0x40] sm:$0xff]  ;;  %s1701_s22 = sshll.u32 %s1697_s16, 4  ;;  %s2123_s26 = scalar_lea.hbm %s2938_s5, 128  ;;  %s1702_s22 = int_to_ptr.hbm [resolvable:$true] %s1701_s22 }
  0x4b   : > { %v2952_v25 = vand.u32 4294901760, %v2383_v17  ;;  %543 = vmatpush.msra.mxu3 %v2364_v5  ;;  %v2950_v28 = vand.u32 4294901760, %v2388_v20  ;;  %v2405_v29 = vand.u32 4294901760, %v326_v19  ;;  %v2408_v30 = vsub.f32 %v330_v13, %v2385_v18  ;;  %v318_v49 = vld [vmem:[#allocation8 + $0x30] sm:$0xff]  ;;  %v316_v55 = vld [vmem:[#allocation8 + $0x20] sm:$0xff]  ;;  %s2117_s23 = sshra.s32 %s1702_s22, 4  ;;  %s2118_s23 = int_to_ptr.hbm [resolvable:$true] %s2117_s23 }
  0x4c   : > { %349 = vmatpush.msra.mxu0 %v2366_v6  ;;  %491 = vmatpush.msra.mxu2 %v2379_v16  ;;  %v388_v31 = vsub.f32 %v2376_v15, %v387_v23  ;;  %v394_v32 = vsub.f32 %v2379_v16, %v2954_v24  ;;  %v2948_v34 = vand.u32 4294901760, %v2391_v21  ;;  %v2423_v36 = vand.u32 4294901760, %v324_v27  ;;  %v314_v62 = vld [vmem:[#allocation8 + $0x10] sm:$0xff]  ;;  %v312_v3 = vld [vmem:[#allocation8] sm:$0xff]  ;;  %s2119_s24 = scalar_lea.hbm %s2118_s23, 16  ;;  %p2124_p7 = scmp.lt.s32.totalorder %s2118_s23, %s2938_s5 }
  0x4d   : > { %v400_v33 = vsub.f32 %v2383_v17, %v2952_v25  ;;  %545 = vmatpush.msra.mxu3 %v2366_v6  ;;  %v2946_v37 = vand.u32 4294901760, %v2394_v22  ;;  %v406_v40 = vsub.f32 %v2388_v20, %v2950_v28  ;;  %v2432_v41 = vsub.f32 %v328_v14, %v2401_v26  ;;  %p2120_p1 = scmp.ne.s32.totalorder %s2118_s23, %s2119_s24  ;;  %p2125_p8 = scmp.lt.s32.totalorder %s2123_s26, %s2119_s24 }
  0x4e   : > { %351 = vmatpush.msra.mxu0 %v2368_v10  ;;  %v389_v38 = vand.u32 4294901760, %v388_v31  ;;  %494 = vmatpush.msra.mxu2 %v2383_v17  ;;  %v395_v39 = vand.u32 4294901760, %v394_v32  ;;  %v2435_v42 = vand.u32 4294901760, %v322_v35  ;;  %v412_v45 = vsub.f32 %v2391_v21, %v2948_v34 }
  0x4f   : > { %547 = vmatpush.msra.mxu3 %v2368_v10  ;;  %v401_v44 = vand.u32 4294901760, %v400_v33  ;;  %v2945_v46 = vand.u32 4294901760, %v2408_v30  ;;  %v2443_v47 = vsub.f32 %v326_v19, %v2405_v29  ;;  %v418_v48 = vsub.f32 %v2394_v22, %v2946_v37  ;;  %v339_v33 = vld [vmem:[#allocation8 + $0xd8] sm:$0xff]  ;;  %p2121_p4 = pnand %p2120_p1, %p2308_p5  ;;  %p2126_p9 = por %p2125_p8, %p2124_p7 }
  0x50   : > { %353 = vmatpush.msra.mxu0 %v2370_v11  ;;  %390 = vmatpush.msra.mxu1 %v389_v38  ;;  %v407_v50 = vand.u32 4294901760, %v406_v40  ;;  %v2451_v51 = vand.u32 4294901760, %v320_v43  ;;  %v2944_v52 = vand.u32 4294901760, %v2432_v41  ;;  %v2455_v53 = vsub.f32 %v324_v27, %v2423_v36 }
  0x51   : > { %497 = vmatpush.msra.mxu2 %v2388_v20  ;;  %549 = vmatpush.msra.mxu3 %v2370_v11  ;;  %v2460_v54 = vsub.f32 %v322_v35, %v2435_v42  ;;  %v413_v56 = vand.u32 4294901760, %v412_v45  ;;  %v424_v57 = vsub.f32 %v2408_v30, %v2945_v46  ;;  %v2466_v58 = vand.u32 4294901760, %v318_v49  ;;  %v337_v45 = vld [vmem:[#allocation8 + $0xc8] sm:$0xff]  ;;  %p2122_p12 = pneg %p2121_p4 }
  0x52   : > { %355 = vmatpush.msra.mxu0 %v2372_v12  ;;  %396 = vmatpush.msra.mxu1 %v395_v39  ;;  %v2943_v59 = vand.u32 4294901760, %v2443_v47  ;;  %v419_v61 = vand.u32 4294901760, %v418_v48  ;;  %v430_v63 = vsub.f32 %v2432_v41, %v2944_v52  ;;  %v2475_v0 = vand.u32 4294901760, %v316_v55  ;;  %v329_v46 = vld [vmem:[#allocation8 + $0x88] sm:$0xff] }
  0x53   : > { %500 = vmatpush.msra.mxu2 %v2391_v21  ;;  %551 = vmatpush.msra.mxu3 %v2372_v12  ;;  %v2941_v1 = vand.u32 4294901760, %v2455_v53  ;;  %v2479_v2 = vsub.f32 %v320_v43, %v2451_v51  ;;  %v2940_v8 = vand.u32 4294901760, %v2460_v54  ;;  %v2484_v9 = vand.u32 4294901760, %v343_v60  ;;  %p2127_p10 = pnand %p2126_p9, %p2122_p12 }
  0x54   : > { %357 = vmatpush.msra.mxu0 %v2385_v18  ;;  %402 = vmatpush.msra.mxu1 %v401_v44  ;;  %v425_v13 = vand.u32 4294901760, %v424_v57  ;;  %v436_v14 = vsub.f32 %v2443_v47, %v2943_v59  ;;  %v2490_v19 = vand.u32 4294901760, %v314_v62  ;;  %v2493_v27 = vsub.f32 %v318_v49, %v2466_v58 }
  0x55   : > { %503 = vmatpush.msra.mxu2 %v2394_v22  ;;  %553 = vmatpush.msra.mxu3 %v2385_v18  ;;  %v2497_v31 = vand.u32 4294901760, %v312_v3  ;;  %v2499_v32 = vand.u32 4294901760, %v341_v7  ;;  %v431_v35 = vand.u32 4294901760, %v430_v63  ;;  %v442_v38 = vsub.f32 %v2455_v53, %v2941_v1 }
  0x56   : > { %359 = vmatpush.msra.mxu0 %v2401_v26  ;;  %408 = vmatpush.msra.mxu1 %v407_v50  ;;  %v2939_v39 = vand.u32 4294901760, %v2479_v2  ;;  %v2507_v40 = vsub.f32 %v316_v55, %v2475_v0  ;;  %v448_v43 = vsub.f32 %v2460_v54, %v2940_v8  ;;  %v2515_v44 = vsub.f32 %v343_v60, %v2484_v9  ;;  %v335_v60 = vld [vmem:[#allocation8 + $0xb8] sm:$0xff] }
  0x57   : > { %506 = vmatpush.msra.mxu2 %v2408_v30  ;;  %555 = vmatpush.msra.mxu3 %v2401_v26  ;;  %2966 = vst [vmem:[#allocation17_spill] sm:$0xff] %v2497_v31  ;;  %v437_v48 = vand.u32 4294901760, %v436_v14  ;;  %v2942_v49 = vand.u32 4294901760, %v2493_v27  ;;  %v2520_v50 = vsub.f32 %v314_v62, %v2490_v19  ;;  %v2522_v55 = vand.u32 4294901760, %v339_v33  ;;  %v333_v14 = vld [vmem:[#allocation8 + $0xa8] sm:$0xff] }
  0x58   : > { %361 = vmatpush.msra.mxu0 %v2405_v29  ;;  %414 = vmatpush.msra.mxu1 %v413_v56  ;;  %v2527_v56 = vsub.f32 %v312_v3, %v2497_v31  ;;  %v2530_v57 = vsub.f32 %v341_v7, %v2499_v32  ;;  %v454_v62 = vsub.f32 %v2479_v2, %v2939_v39  ;;  %v2947_v63 = vand.u32 4294901760, %v2507_v40 }
  0x59   : > { %509 = vmatpush.msra.mxu2 %v2432_v41  ;;  %557 = vmatpush.msra.mxu3 %v2405_v29  ;;  %v449_v3 = vand.u32 4294901760, %v448_v43  ;;  %v2949_v7 = vand.u32 4294901760, %v2515_v44  ;;  %v2548_v39 = vsub.f32 %v339_v33, %v2522_v55  ;;  %v2550_v8 = vand.u32 4294901760, %v335_v60  ;;  %v331_v43 = vld [vmem:[#allocation8 + $0x98] sm:$0xff] }
  0x5a   : > { %363 = vmatpush.msra.mxu0 %v2423_v36  ;;  %420 = vmatpush.msra.mxu1 %v419_v61  ;;  %v443_v61 = vand.u32 4294901760, %v442_v38  ;;  %v2951_v38 = vand.u32 4294901760, %v2520_v50  ;;  %v2955_v1 = vand.u32 4294901760, %v2527_v56  ;;  %v466_v33 = vsub.f32 %v2507_v40, %v2947_v63 }
  0x5b   : > { %512 = vmatpush.msra.mxu2 %v2443_v47  ;;  %559 = vmatpush.msra.mxu3 %v2423_v36  ;;  %v2563_v52 = vand.u32 4294901760, %v333_v14  ;;  %v729_v37 = vsub.f32 %v2515_v44, %v2949_v7  ;;  %v2956_v63 = vand.u32 4294901760, %v2548_v39  ;;  %v2578_v34 = vsub.f32 %v335_v60, %v2550_v8 }
  0x5c   : > { %365 = vmatpush.msra.mxu0 %v2435_v42  ;;  %426 = vmatpush.msra.mxu1 %v425_v13  ;;  %v2537_v13 = vand.u32 4294901760, %v337_v45  ;;  %v2585_v28 = vand.u32 4294901760, %v329_v46  ;;  %v478_v60 = vsub.f32 %v2527_v56, %v2955_v1  ;;  %v2967_v15 = vand.u32 4294901760, %v2379_v16 }
  0x5d   : > { %515 = vmatpush.msra.mxu2 %v2455_v53  ;;  %561 = vmatpush.msra.mxu3 %v2435_v42  ;;  %v2593_v25 = vsub.f32 %v333_v14, %v2563_v52  ;;  %v741_v1 = vsub.f32 %v2548_v39, %v2956_v63  ;;  %v2969_v16 = vand.u32 4294901760, %v2383_v17  ;;  %v2971_v17 = vand.u32 4294901760, %v2388_v20 }
  0x5e   : > { %367 = vmatpush.msra.mxu0 %v2451_v51  ;;  %432 = vmatpush.msra.mxu1 %v431_v35  ;;  %v460_v35 = vsub.f32 %v2493_v27, %v2942_v49  ;;  %v455_v49 = vand.u32 4294901760, %v454_v62  ;;  %v2561_v59 = vsub.f32 %v337_v45, %v2537_v13  ;;  %v472_v45 = vsub.f32 %v2520_v50, %v2951_v38 }
  0x5f   : > { %518 = vmatpush.msra.mxu2 %v2460_v54  ;;  %563 = vmatpush.msra.mxu3 %v2451_v51  ;;  %v2973_v20 = vand.u32 4294901760, %v2391_v21  ;;  %v2975_v21 = vand.u32 4294901760, %v2394_v22  ;;  %v2977_v22 = vand.u32 4294901760, %v2408_v30  ;;  %v2979_v30 = vand.u32 4294901760, %v2432_v41  ;;  %v313_v41 = vld [vmem:[#allocation8 + $0x8] sm:$0xff] }
  0x60   : > { %369 = vmatpush.msra.mxu0 %v2466_v58  ;;  %438 = vmatpush.msra.mxu1 %v437_v48  ;;  %v2953_v48 = vand.u32 4294901760, %v2530_v57  ;;  %v461_v62 = vand.u32 4294901760, %v460_v35  ;;  %v467_v35 = vand.u32 4294901760, %v466_v33  ;;  %v473_v33 = vand.u32 4294901760, %v472_v45 }
  0x61   : > { %521 = vmatpush.msra.mxu2 %v2479_v2  ;;  %565 = vmatpush.msra.mxu3 %v2466_v58  ;;  %v2968_v45 = vand.u32 4294901760, %v2561_v59 }
  0x62   : > { %371 = vmatpush.msra.mxu0 %v2475_v0  ;;  %444 = vmatpush.msra.mxu1 %v443_v61  ;;  %v2570_v61 = vand.u32 4294901760, %v331_v43  ;;  %v735_v7 = vsub.f32 %v2530_v57, %v2953_v48  ;;  %v730_v48 = vand.u32 4294901760, %v729_v37  ;;  %v2612_v37 = vsub.f32 %v329_v46, %v2585_v28 }
  0x63   : > { %524 = vmatpush.msra.mxu2 %v2493_v27  ;;  %567 = vmatpush.msra.mxu3 %v2475_v0  ;;  %v747_v63 = vsub.f32 %v2561_v59, %v2968_v45 }
  0x64   : > { %373 = vmatpush.msra.mxu0 %v2490_v19  ;;  %450 = vmatpush.msra.mxu1 %v449_v3  ;;  %v327_v3 = vld [vmem:[#allocation8 + $0x78] sm:$0xff]  ;;  %v2599_v24 = vsub.f32 %v331_v43, %v2570_v61 }
  0x65   : > { %527 = vmatpush.msra.mxu2 %v2507_v40  ;;  %569 = vmatpush.msra.mxu3 %v2490_v19  ;;  %v2606_v38 = vand.u32 4294901760, %v327_v3  ;;  %v323_v43 = vld [vmem:[#allocation8 + $0x58] sm:$0xff] }
  0x66   : > { %375 = vmatpush.msra.mxu0 %v2497_v31  ;;  %456 = vmatpush.msra.mxu1 %v455_v49  ;;  %v325_v49 = vld [vmem:[#allocation8 + $0x68] sm:$0xff]  ;;  %v2631_v14 = vand.u32 4294901760, %v323_v43 }
  0x67   : > { %530 = vmatpush.msra.mxu2 %v2520_v50  ;;  %571 = vmatpush.msra.mxu3 %v2497_v31  ;;  %v2619_v31 = vand.u32 4294901760, %v325_v49  ;;  %v2629_v45 = vsub.f32 %v327_v3, %v2606_v38 }
  0x68   : > { %582 = vmatpush.msrb.mxu0 %v387_v23  ;;  %462 = vmatpush.msra.mxu1 %v461_v62  ;;  %v736_v23 = vand.u32 4294901760, %v735_v7  ;;  %v479_v62 = vand.u32 4294901760, %v478_v60  ;;  %v321_v7 = vld [vmem:[#allocation8 + $0x48] sm:$0xff]  ;;  %v2970_v60 = vand.u32 4294901760, %v2578_v34 }
  0x69   : > { %533 = vmatpush.msra.mxu2 %v2527_v56  ;;  %731 = vmatpush.msrb.mxu3 %v730_v48  ;;  %v2641_v3 = vsub.f32 %v325_v49, %v2619_v31  ;;  %v2643_v46 = vand.u32 4294901760, %v321_v7 }
  0x6a   : > { %586 = vmatpush.msrb.mxu0 %v2967_v15  ;;  %468 = vmatpush.msra.mxu1 %v467_v35  ;;  %v742_v35 = vand.u32 4294901760, %v741_v1  ;;  %v753_v15 = vsub.f32 %v2578_v34, %v2970_v60  ;;  %v748_v1 = vand.u32 4294901760, %v747_v63 }
  0x6b   : > { %686 = vmatpush.msrb.mxu2 %v2484_v9  ;;  %737 = vmatpush.msrb.mxu3 %v736_v23  ;;  %v2974_v23 = vand.u32 4294901760, %v2599_v24 }
  0x6c   : > { %590 = vmatpush.msrb.mxu0 %v2969_v16  ;;  %474 = vmatpush.msra.mxu1 %v473_v33  ;;  %v319_v16 = vld [vmem:[#allocation8 + $0x38] sm:$0xff]  ;;  %v2972_v33 = vand.u32 4294901760, %v2593_v25  ;;  %v754_v63 = vand.u32 4294901760, %v753_v15 }
  0x6d   : > { %688 = vmatpush.msrb.mxu2 %v2499_v32  ;;  %743 = vmatpush.msrb.mxu3 %v742_v35  ;;  %v2658_v48 = vand.u32 4294901760, %v319_v16 }
  0x6e   : > { %594 = vmatpush.msrb.mxu0 %v2971_v17  ;;  %480 = vmatpush.msra.mxu1 %v479_v62  ;;  %v759_v60 = vsub.f32 %v2593_v25, %v2972_v33  ;;  %v765_v62 = vsub.f32 %v2599_v24, %v2974_v23  ;;  %v2651_v17 = vld [vmem:[#allocation2] sm:$0xff]  ;;  %v2656_v33 = vsub.f32 %v323_v43, %v2631_v14  ;;  %v317_v23 = vld [vmem:[#allocation8 + $0x28] sm:$0xff] }
  0x6f   : > { %690 = vmatpush.msrb.mxu2 %v2522_v55  ;;  %749 = vmatpush.msrb.mxu3 %v748_v1  ;;  %v2669_v43 = vsub.f32 %v321_v7, %v2643_v46  ;;  %v2672_v49 = vand.u32 4294901760, %v2651_v17  ;;  %v2978_v1 = vand.u32 4294901760, %v2629_v45  ;;  %v2685_v15 = vsub.f32 %v319_v16, %v2658_v48 }
  0x70   : > { %598 = vmatpush.msrb.mxu0 %v2973_v20  ;;  %649 = vmatpush.msrb.mxu1 %v2362_v4  ;;  %v2976_v4 = vand.u32 4294901760, %v2612_v37  ;;  %v760_v35 = vand.u32 4294901760, %v759_v60  ;;  %v788_v7 = vand.u32 4294901760, %v2656_v33 }
  0x71   : > { %692 = vmatpush.msrb.mxu2 %v2537_v13  ;;  %755 = vmatpush.msrb.mxu3 %v754_v63  ;;  %v777_v60 = vsub.f32 %v2629_v45, %v2978_v1  ;;  %v2697_v1 = vsub.f32 %v2651_v17, %v2672_v49 }
  0x72   : > { %602 = vmatpush.msrb.mxu0 %v2975_v21  ;;  %651 = vmatpush.msrb.mxu1 %v2364_v5  ;;  %v771_v20 = vsub.f32 %v2612_v37, %v2976_v4  ;;  %v766_v5 = vand.u32 4294901760, %v765_v62  ;;  %v315_v21 = vld [vmem:[#allocation8 + $0x18] sm:$0xff]  ;;  %v2682_v4 = vand.u32 4294901760, %v317_v23  ;;  %v2980_v62 = vand.u32 4294901760, %v2641_v3 }
  0x73   : > { %694 = vmatpush.msrb.mxu2 %v2550_v8  ;;  %761 = vmatpush.msrb.mxu3 %v760_v35  ;;  %v2699_v16 = vand.u32 4294901760, %v315_v21  ;;  %v800_v35 = vand.u32 4294901760, %v2685_v15 }
  0x74   : > { %606 = vmatpush.msrb.mxu0 %v2977_v22  ;;  %653 = vmatpush.msrb.mxu1 %v2366_v6  ;;  %v772_v6 = vand.u32 4294901760, %v771_v20  ;;  %v783_v63 = vsub.f32 %v2641_v3, %v2980_v62  ;;  %v789_v20 = vsub.f32 %v2656_v33, %v788_v7  ;;  %v2710_v62 = vsub.f32 %v317_v23, %v2682_v4 }
  0x75   : > { %696 = vmatpush.msrb.mxu2 %v2563_v52  ;;  %767 = vmatpush.msrb.mxu3 %v766_v5  ;;  %v2982_v22 = vand.u32 4294901760, %v2455_v53  ;;  %v2983_v5 = vand.u32 4294901760, %v2669_v43  ;;  %v2725_v23 = vsub.f32 %v315_v21, %v2699_v16  ;;  %v2984_v53 = vand.u32 4294901760, %v2460_v54 }
  0x76   : > { %610 = vmatpush.msrb.mxu0 %v2979_v30  ;;  %655 = vmatpush.msrb.mxu1 %v2368_v10  ;;  %v2981_v30 = vand.u32 4294901760, %v2443_v47  ;;  %v778_v10 = vand.u32 4294901760, %v777_v60  ;;  %v2715_v47 = vand.u32 4294901760, %v313_v41 }
  0x77   : > { %698 = vmatpush.msrb.mxu2 %v2570_v61  ;;  %773 = vmatpush.msrb.mxu3 %v772_v6  ;;  %v795_v60 = vsub.f32 %v2669_v43, %v2983_v5  ;;  %v801_v6 = vsub.f32 %v2685_v15, %v800_v35  ;;  %v2988_v5 = vand.u32 4294901760, %v2520_v50 }
  0x78   : > { %614 = vmatpush.msrb.mxu0 %v2981_v30  ;;  %657 = vmatpush.msrb.mxu1 %v2370_v11  ;;  %v784_v11 = vand.u32 4294901760, %v783_v63  ;;  %v2722_v30 = vand.u32 4294901760, %v2697_v1  ;;  %v806_v63 = vand.u32 4294901760, %v2710_v62  ;;  %v2739_v54 = vsub.f32 %v313_v41, %v2715_v47 }
  0x79   : > { %700 = vmatpush.msrb.mxu2 %v2585_v28  ;;  %779 = vmatpush.msrb.mxu3 %v778_v10  ;;  %v812_v10 = vand.u32 4294901760, %v2725_v23  ;;  %v2987_v41 = vand.u32 4294901760, %v2507_v40  ;;  %v2989_v40 = vand.u32 4294901760, %v2527_v56 }
  0x7a   : > { %618 = vmatpush.msrb.mxu0 %v2982_v22  ;;  %659 = vmatpush.msrb.mxu1 %v2372_v12  ;;  %v790_v12 = vand.u32 4294901760, %v789_v20  ;;  %v2985_v22 = vand.u32 4294901760, %v2479_v2  ;;  %v379_v21 = vsub.f32 %v2697_v1, %v2722_v30  ;;  %v2986_v20 = vand.u32 4294901760, %v2493_v27 }
  0x7b   : > { %702 = vmatpush.msrb.mxu2 %v2606_v38  ;;  %785 = vmatpush.msrb.mxu3 %v784_v11  ;;  %v807_v2 = vsub.f32 %v2710_v62, %v806_v63  ;;  %v818_v11 = vand.u32 4294901760, %v2739_v54 }
  0x7c   : > { %622 = vmatpush.msrb.mxu0 %v2984_v53  ;;  %661 = vmatpush.msrb.mxu1 %v2385_v18  ;;  %v796_v18 = vand.u32 4294901760, %v795_v60  ;;  %v2757_v27 = vand.u32 4294901760, %v379_v21 }
  0x7d   : > { %704 = vmatpush.msrb.mxu2 %v2619_v31  ;;  %791 = vmatpush.msrb.mxu3 %v790_v12  ;;  %v819_v60 = vsub.f32 %v2739_v54, %v818_v11 }
  0x7e   : > { %626 = vmatpush.msrb.mxu0 %v2985_v22  ;;  %663 = vmatpush.msrb.mxu1 %v2401_v26  ;;  %v802_v26 = vand.u32 4294901760, %v801_v6 }
  0x7f   : > { %706 = vmatpush.msrb.mxu2 %v2631_v14  ;;  %797 = vmatpush.msrb.mxu3 %v796_v18 }
  0x80   : > { %630 = vmatpush.msrb.mxu0 %v2986_v20  ;;  %665 = vmatpush.msrb.mxu1 %v2405_v29  ;;  %v813_v29 = vsub.f32 %v2725_v23, %v812_v10 }
  0x81   : > { %708 = vmatpush.msrb.mxu2 %v2643_v46  ;;  %803 = vmatpush.msrb.mxu3 %v802_v26 }
  0x82   : > { %634 = vmatpush.msrb.mxu0 %v2987_v41  ;;  %667 = vmatpush.msrb.mxu1 %v2423_v36  ;;  %v808_v36 = vand.u32 4294901760, %v807_v2  ;;  %v814_v50 = vand.u32 4294901760, %v813_v29 }
  0x83   : > { %710 = vmatpush.msrb.mxu2 %v2658_v48  ;;  %381 = vmatmul.f32.vlgmr.msra.gmra.mxu0 %v2757_v27 }
  0x84   : > { %638 = vmatpush.msrb.mxu0 %v2988_v5  ;;  %669 = vmatpush.msrb.mxu1 %v2435_v42  ;;  %v820_v42 = vand.u32 4294901760, %v819_v60 }
  0x85   : > { %712 = vmatpush.msrb.mxu2 %v2682_v4  ;;  %809 = vmatpush.msrb.mxu3 %v808_v36  ;;  %v1934_v36 = vld [vmem:[#allocation11] ss:$0 sm:$0xff] }
  0x86   : > { %642 = vmatpush.msrb.mxu0 %v2989_v40  ;;  %671 = vmatpush.msrb.mxu1 %v2451_v51  ;;  %v2990_v51 = vand.u32 4294901760, %v2515_v44 }
  0x87   : > { %714 = vmatpush.msrb.mxu2 %v2699_v16  ;;  %815 = vmatpush.msrb.mxu3 %v814_v50 }
  0x88   : > { %829 = vmatpush.msra.mxu0 %v2515_v44  ;;  %673 = vmatpush.msrb.mxu1 %v2466_v58  ;;  %v2991_v58 = vand.u32 4294901760, %v2530_v57  ;;  %v2993_v44 = vand.u32 4294901760, %v2548_v39 }
  0x89   : > { %536 = vmatmul.f32.vlgmr.msra.gmra.mxu2 %v2697_v1  ;;  %575 = vmatmul.f32.vlgmr.msra.gmra.mxu3 %v2722_v30 }
  0x8a   : > { %832 = vmatpush.msra.mxu0 %v2530_v57  ;;  %675 = vmatpush.msrb.mxu1 %v2475_v0  ;;  %v2992_v0 = vld [vmem:[#allocation17_spill] sm:$0xff] }
  0x8b   : > { %716 = vmatpush.msrb.mxu2 %v2715_v47  ;;  %821 = vmatpush.msrb.mxu3 %v820_v42 }
  0x8c   : > { %835 = vmatpush.msra.mxu0 %v2548_v39  ;;  %677 = vmatpush.msrb.mxu1 %v2490_v19  ;;  %v2994_v19 = vand.u32 4294901760, %v2561_v59  ;;  %v1031_v39 = vld [vmem:[#allocation9] sm:$0xff] }
  0x8d   : > { %923 = vmatpush.msra.mxu2 %v2990_v51  ;;  %482 = vmatmul.f32.vlgmr.msra.gmra.mxu1 %v2672_v49 }
  0x8e   : > { %838 = vmatpush.msra.mxu0 %v2561_v59  ;;  %990 = vmatpush.msra.mxu3 %v2484_v9  ;;  %v2996_v59 = vand.u32 4294901760, %v2593_v25 }
  0x8f   : > { %927 = vmatpush.msra.mxu2 %v2991_v58  ;;  %679 = vmatpush.msrb.mxu1 %v2992_v0 }
  0x90   : > { %841 = vmatpush.msra.mxu0 %v2578_v34  ;;  %992 = vmatpush.msra.mxu3 %v2499_v32 }
  0x91   : > { %882 = vmatpush.msra.mxu1 %v2484_v9  ;;  %931 = vmatpush.msra.mxu2 %v2993_v44  ;;  %v2995_v9 = vand.u32 4294901760, %v2578_v34  ;;  %v2997_v34 = vand.u32 4294901760, %v2599_v24 }
  0x92   : > { %844 = vmatpush.msra.mxu0 %v2593_v25  ;;  %994 = vmatpush.msra.mxu3 %v2522_v55 }
  0x93   : > { %884 = vmatpush.msra.mxu1 %v2499_v32  ;;  %935 = vmatpush.msra.mxu2 %v2994_v19  ;;  %v311_v32 = vld [vmem:[%s2343_s15] sm:$0xff] }
  0x94   : > { %644 = vmatmul.f32.vlgmr.msrb.gmra.mxu0 %v2672_v49  ;;  %996 = vmatpush.msra.mxu3 %v2537_v13  ;;  %v1034_v25 = vsel %vm1032_vm0, %v311_v32, 0 }
  0x95   : > { %886 = vmatpush.msra.mxu1 %v2522_v55  ;;  %847 = vmatpush.msra.mxu0 %v2599_v24  ;;  %v2998_v55 = vand.u32 4294901760, %v2612_v37  ;;  %v2999_v24 = vand.u32 4294901760, %v2629_v45  ;;  %v1053_v56 = vand.u32 4294901760, %v1034_v25 }
  0x96   : > { %939 = vmatpush.msra.mxu2 %v2995_v9  ;;  %681 = vmatmul.f32.vlgmr.msrb.gmra.mxu1 %v2672_v49 }
  0x97   : > { %850 = vmatpush.msra.mxu0 %v2612_v37  ;;  %888 = vmatpush.msra.mxu1 %v2537_v13  ;;  %v1054_v13 = vsub.f32 %v1034_v25, %v1053_v56 }
  0x98   : > { %943 = vmatpush.msra.mxu2 %v2996_v59  ;;  %998 = vmatpush.msra.mxu3 %v2550_v8 }
  0x99   : > { %853 = vmatpush.msra.mxu0 %v2629_v45  ;;  %890 = vmatpush.msra.mxu1 %v2550_v8  ;;  %v1051_v8 = vand.u32 4294901760, %v1031_v39 }
  0x9a   : > { %947 = vmatpush.msra.mxu2 %v2997_v34  ;;  %1000 = vmatpush.msra.mxu3 %v2563_v52 }
  0x9b   : > { %856 = vmatpush.msra.mxu0 %v2641_v3  ;;  %892 = vmatpush.msra.mxu1 %v2563_v52  ;;  %v3000_v52 = vand.u32 4294901760, %v2641_v3  ;;  %v1078_v57 = vsub.f32 %v1031_v39, %v1051_v8 }
  0x9c   : > { %951 = vmatpush.msra.mxu2 %v2998_v55  ;;  %1002 = vmatpush.msra.mxu3 %v2570_v61 }
  0x9d   : > { %859 = vmatpush.msra.mxu0 %v2656_v33  ;;  %894 = vmatpush.msra.mxu1 %v2570_v61  ;;  %v1079_v61 = vand.u32 4294901760, %v1078_v57 }
  0x9e   : > { %955 = vmatpush.msra.mxu2 %v2999_v24  ;;  %1004 = vmatpush.msra.mxu3 %v2585_v28 }
  0x9f   : > { %862 = vmatpush.msra.mxu0 %v2669_v43  ;;  %896 = vmatpush.msra.mxu1 %v2585_v28  ;;  %v3001_v28 = vand.u32 4294901760, %v2669_v43 }
  0xa0   : > { %959 = vmatpush.msra.mxu2 %v3000_v52  ;;  %1006 = vmatpush.msra.mxu3 %v2606_v38 }
  0xa1   : > { %865 = vmatpush.msra.mxu0 %v2685_v15  ;;  %898 = vmatpush.msra.mxu1 %v2606_v38  ;;  %v1055_v38 = vand.u32 4294901760, %v1054_v13 }
  0xa2   : > { %963 = vmatpush.msra.mxu2 %v788_v7  ;;  %1008 = vmatpush.msra.mxu3 %v2619_v31 }
  0xa3   : > { %868 = vmatpush.msra.mxu0 %v2710_v62  ;;  %900 = vmatpush.msra.mxu1 %v2619_v31  ;;  %v1056_v31 = vsub.f32 %v1054_v13, %v1055_v38 }
  0xa4   : > { %967 = vmatpush.msra.mxu2 %v3001_v28  ;;  %1010 = vmatpush.msra.mxu3 %v2631_v14 }
  0xa5   : > { %722 = vmatmul.f32.vlgmr.msrb.gmra.mxu2 %v2757_v27  ;;  %823 = vmatmul.f32.vlgmr.msrb.gmra.mxu3 %v2672_v49  ;;  %v1057_v37 = vand.u32 4294901760, %v1056_v31 }
  0xa6   : > { %871 = vmatpush.msra.mxu0 %v2725_v23  ;;  %902 = vmatpush.msra.mxu1 %v2631_v14  ;;  %v1080_v14 = vsub.f32 %v1078_v57, %v1079_v61 }
  0xa7   : > { %971 = vmatpush.msra.mxu2 %v800_v35  ;;  %1012 = vmatpush.msra.mxu3 %v2643_v46 }
  0xa8   : > { %874 = vmatpush.msra.mxu0 %v2739_v54  ;;  %904 = vmatpush.msra.mxu1 %v2643_v46  ;;  %v1081_v46 = vand.u32 4294901760, %v1080_v14 }
  0xa9   : > { %975 = vmatpush.msra.mxu2 %v806_v63  ;;  %1014 = vmatpush.msra.mxu3 %v2658_v48 }
  0xaa   : > { %877 = vmatmul.f32.vlgmr.msra.gmra.mxu0 %v2697_v1  ;;  %906 = vmatpush.msra.mxu1 %v2658_v48 }
  0xab   : > { %979 = vmatpush.msra.mxu2 %v812_v10  ;;  %1016 = vmatpush.msra.mxu3 %v2682_v4 }
  0xac   : > { %908 = vmatpush.msra.mxu1 %v2682_v4  ;;  %1052 = vmatpush.msrb.mxu0 %v1051_v8 }
  0xad   : > { %983 = vmatpush.msra.mxu2 %v818_v11  ;;  %1018 = vmatpush.msra.mxu3 %v2699_v16 }
  0xae   : > { %985 = vmatmul.f32.vlgmr.msra.gmra.mxu2 %v2672_v49  ;;  %910 = vmatpush.msra.mxu1 %v2699_v16 }
  0xaf   : > { %1105 = vmatpush.msrb.mxu2 %v1078_v57  ;;  %1020 = vmatpush.msra.mxu3 %v2715_v47 }
  0xb0   : > { %1022 = vmatmul.f32.vlgmr.msra.gmra.mxu3 %v2672_v49  ;;  %912 = vmatpush.msra.mxu1 %v2715_v47 }
  0xb1   : > { %1128 = vmatpush.msrb.mxu3 %v1051_v8  ;;  %916 = vmatmul.f32.vlgmr.msra.gmra.mxu1 %v2722_v30 }
  0xb2   : > { %1058 = vmatmul.f32.vlgmr.msrb.gmra.mxu0 %v1057_v37  ;;  %1082 = vmatpush.msrb.mxu1 %v1081_v46 }
  0xb3   : > { %1154 = vmatpush.msra.mxu0 %v1079_v61  ;;  %v1224_v61 = vld [vmem:[#allocation9 + $0x18] sm:$0xff] }
  0xb4   : > { %1176 = vmatpush.msra.mxu1 %v1051_v8  ;;  %v1246_v14 = vand.u32 4294901760, %v1224_v61 }
  0xb6   : > { %1108 = vmatmul.f32.vlgmr.msrb.gmra.mxu2 %v1054_v13  ;;  %v1280_v46 = vsub.f32 %v1224_v61, %v1246_v14 }
  0xb8   : > { %1132 = vmatmul.f32.vlgmr.msrb.gmra.mxu3 %v1055_v38  ;;  %v1225_v38 = vld [vmem:[#allocation9 + $0x20] sm:$0xff] }
  0xb9   : > { %1084 = vmatmul.f32.vlgmr.msrb.gmra.mxu1 %v1053_v56  ;;  %v1244_v31 = vand.u32 4294901760, %v1225_v38 }
  0xba   : > { %1156 = vmatmul.f32.vlgmr.msra.gmra.mxu0 %v1053_v56 }
  0xbb   : > { %v1274_v37 = vsub.f32 %v1225_v38, %v1244_v31  ;;  %1345 = vmatpush.msrb.mxu1 %v1244_v31  ;;  %1245 = vmatpush.msra.mxu2 %v1244_v31 }
  0xbd   : > { %1316 = vmatpush.msrb.mxu0 %v1274_v37  ;;  %1347 = vmatpush.msrb.mxu1 %v1246_v14 }
  0xbe   : > { %1247 = vmatpush.msra.mxu2 %v1246_v14 }
  0xbf   : > { %1319 = vmatpush.msrb.mxu0 %v1280_v46 }
  0xc1   : > { %1178 = vmatmul.f32.vlgmr.msra.gmra.mxu1 %v1053_v56 }
 0x100   : > { %v382_v45 = vpop.f32.mrf.mxu0 }
 0x10a   : > { %v483_v48 = vpop.f32.mrf.mxu1 }
 0x10b   : > { %v484_v49 = vadd.f32 %v483_v48, %v382_v45  ;;  %v1275_v45 = vand.u32 4294901760, %v1274_v37  ;;  %v1281_v48 = vand.u32 4294901760, %v1280_v46 }
 0x10c   : > { %v537_v33 = vpop.f32.mrf.mxu2  ;;  %v576_v15 = vpop.f32.mrf.mxu3 }
 0x10d   : > { %v538_v7 = vadd.f32 %v537_v33, %v484_v49  ;;  %v1282_v33 = vsub.f32 %v1280_v46, %v1281_v48 }
 0x10f   : > { %v577_v62 = vadd.f32 %v576_v15, %v538_v7  ;;  %v1283_v49 = vand.u32 4294901760, %v1282_v33 }
 0x111   : > { %v645_v3 = vpop.f32.mrf.mxu0 }
 0x112   : > { %v646_v23 = vadd.f32 %v645_v3, %v577_v62  ;;  %v1276_v3 = vsub.f32 %v1274_v37, %v1275_v45 }
 0x113   : > { %v682_v43 = vpop.f32.mrf.mxu1 }
 0x114   : > { %v683_v22 = vadd.f32 %v682_v43, %v646_v23  ;;  %v1277_v15 = vand.u32 4294901760, %v1276_v3  ;;  %v1463_v3 = vld [vmem:[#allocation9 + $0x38] sm:$0xff] }
 0x116   : > { %1278 = vmatpush.msra.mxu3 %v1277_v15  ;;  %v1485_v15 = vand.u32 4294901760, %v1463_v3 }
 0x118   : > { %1284 = vmatpush.msra.mxu3 %v1283_v49 }
 0x127   : > { %v878_v4 = vpop.f32.mrf.mxu0 }
 0x128   : > { %v723_v1 = vpop.f32.mrf.mxu2  ;;  %v824_v16 = vpop.f32.mrf.mxu3 }
 0x129   : > { %v825_v35 = vadd.f32 %v824_v16, %v723_v1  ;;  %v1222_v16 = vld [vmem:[#allocation9 + $0x8] sm:$0xff] }
 0x12a   : > { %v1250_v62 = vand.u32 4294901760, %v1222_v16 }
 0x12b   : > { %v879_v47 = vadd.f32 %v878_v4, %v825_v35  ;;  %v1223_v4 = vld [vmem:[#allocation9 + $0x10] sm:$0xff] }
 0x12c   : > { %v1248_v1 = vand.u32 4294901760, %v1223_v4 }
 0x12e   : > { %v917_v30 = vpop.f32.mrf.mxu1  ;;  %v1286_v35 = vsub.f32 %v1223_v4, %v1248_v1  ;;  %1349 = vmatpush.msrb.mxu1 %v1248_v1  ;;  %1249 = vmatpush.msra.mxu2 %v1248_v1 }
 0x12f   : > { %v918_v53 = vadd.f32 %v917_v30, %v879_v47  ;;  %v1059_v6 = vpop.f32.mrf.mxu0  ;;  %v1292_v30 = vsub.f32 %v1222_v16, %v1250_v62 }
 0x130   : > { %v1060_v21 = vadd.f32 %v1059_v6, %v683_v22  ;;  %v1287_v47 = vand.u32 4294901760, %v1286_v35  ;;  %1322 = vmatpush.msrb.mxu0 %v1286_v35  ;;  %1351 = vmatpush.msrb.mxu1 %v1250_v62 }
 0x131   : > { %v986_v12 = vpop.f32.mrf.mxu2  ;;  %1251 = vmatpush.msra.mxu2 %v1250_v62 }
 0x132   : > { %v987_v63 = vadd.f32 %v986_v12, %v918_v53  ;;  %v1288_v23 = vsub.f32 %v1286_v35, %v1287_v47  ;;  %v1293_v53 = vand.u32 4294901760, %v1292_v30  ;;  %1325 = vmatpush.msrb.mxu0 %v1292_v30 }
 0x133   : > { %v1023_v54 = vpop.f32.mrf.mxu3  ;;  %1374 = vmatpush.msrb.mxu2 %v1275_v45 }
 0x134   : > { %v2871_v18 = vadd.f32 %v1023_v54, %v987_v63  ;;  %v1289_v12 = vand.u32 4294901760, %v1288_v23  ;;  %v1294_v6 = vsub.f32 %v1292_v30, %v1293_v53  ;;  %v1462_v30 = vld [vmem:[#allocation9 + $0x30] sm:$0xff] }
 0x135   : > { %1378 = vmatpush.msrb.mxu2 %v1281_v48  ;;  %v1464_v48 = vld [vmem:[#allocation9 + $0x40] sm:$0xff]  ;;  %v1487_v23 = vand.u32 4294901760, %v1462_v30 }
 0x136   : > { %v1085_v10 = vpop.f32.mrf.mxu1  ;;  %1290 = vmatpush.msra.mxu3 %v1289_v12  ;;  %v1295_v63 = vand.u32 4294901760, %v1294_v6  ;;  %v1483_v33 = vand.u32 4294901760, %v1464_v48 }
 0x137   : > { %v1086_v20 = vadd.f32 %v1085_v10, %v1060_v21  ;;  %v1157_v11 = vpop.f32.mrf.mxu0  ;;  %1382 = vmatpush.msrb.mxu2 %v1287_v47  ;;  %v1525_v12 = vsub.f32 %v1462_v30, %v1487_v23 }
 0x138   : > { %1296 = vmatpush.msra.mxu3 %v1295_v63  ;;  %v1513_v49 = vsub.f32 %v1464_v48, %v1483_v33  ;;  %1484 = vmatpush.msra.mxu0 %v1483_v33 }
 0x139   : > { %v1109_v26 = vpop.f32.mrf.mxu2  ;;  %1386 = vmatpush.msrb.mxu2 %v1293_v53  ;;  %v1461_v53 = vld [vmem:[#allocation9 + $0x28] sm:$0xff]  ;;  %v1526_v63 = vand.u32 4294901760, %v1525_v12 }
 0x13a   : > { %v1110_v2 = vadd.f32 %v1109_v26, %v1086_v20  ;;  %1405 = vmatpush.msrb.mxu3 %v1244_v31  ;;  %1486 = vmatpush.msra.mxu0 %v1485_v15  ;;  %v1489_v6 = vand.u32 4294901760, %v1461_v53 }
 0x13b   : > { %v1133_v41 = vpop.f32.mrf.mxu3 }
 0x13c   : > { %v1134_v27 = vadd.f32 %v1133_v41, %v1110_v2  ;;  %1407 = vmatpush.msrb.mxu3 %v1246_v14  ;;  %1488 = vmatpush.msra.mxu0 %v1487_v23 }
 0x13e   : > { %v1158_v29 = vadd.f32 %v1157_v11, %v1134_v27  ;;  %v1179_v5 = vpop.f32.mrf.mxu1  ;;  %1409 = vmatpush.msrb.mxu3 %v1248_v1  ;;  %1490 = vmatpush.msra.mxu0 %v1489_v6 }
 0x140   : > { %v1180_v40 = vadd.f32 %v1179_v5, %v1158_v29  ;;  %1411 = vmatpush.msrb.mxu3 %v1250_v62 }
 0x142   : > { %v1183_v60 = vadd.f32 %v1934_v36, %v1180_v40 }
 0x144   : > { %v1827_v50 = vmul.f32 -1.442695, %v1183_v60 }
 0x146   : > { %1939 = vpow2.f32 %v1827_v50 }
 0x14c   : > { %v1940_v42 = vpop.eup %1939 }
 0x14d   : > { %v1187_v51 = vadd.f32 1.0, %v1940_v42 }
 0x14f   : > { %1941 = vrcp.f32 %v1187_v51  ;;  %v1199_v19 = vand.u32 2147483648, %v1187_v51  ;;  %v1197_v59 = vand.u32 2147483647, %v1187_v51  ;;  %vm1193_vm2 = vweird.f32 %v1187_v51 }
 0x151   : > { %v1200_v34 = vor.u32 1.1754944e-38, %v1199_v19  ;;  %vm1198_vm4 = vcmp.eq.f32.partialorder %v1197_v59, 8.507059e+37 }
 0x155   : > { %v1942_v58 = vpop.eup %1941 }
 0x156   : > { %v1189_v0 = vmul.f32 %v1942_v58, %v1187_v51  ;;  %vm1194_vm1 = vweird.f32 %v1942_v58  ;;  %v1935_v51 = vld [vmem:[#allocation11 + $0x1] ss:$0 sm:$0xff] }
 0x157   : > { %vm1195_vm3 = vmor %vm1193_vm2, %vm1194_vm1 }
 0x158   : > { %v1190_v44 = vsub.f32 1.0, %v1189_v0 }
 0x15a   : > { %v1191_v9 = vmul.f32 %v1942_v58, %v1190_v44 }
 0x15c   : > { %v1192_v32 = vadd.f32 %v1942_v58, %v1191_v9 }
 0x15e   : > { %v1196_v39 = vsel %vm1195_vm3, %v1942_v58, %v1192_v32 }
 0x15f   : > { %v1201_v25 = vsel %vm1198_vm4, %v1200_v34, %v1196_v39 }
 0x160   : > { %v1203_v55 = vmul.f32 2.0, %v1201_v25  ;;  %v1205_v52 = vmul.f32 %v1201_v25, %v2651_v17 }
 0x162   : > { %v1828_v24 = vadd.f32 -1.0, %v1203_v55 }
 0x164   : > { %1207 = vrot.lane.b32.xlu0 %v1828_v24, %s2187_s7 }
 0x1d6   : > { %v1208_v8 = vpop.permute.xlu0 %1207 }
 0x1d7   : > { %v1210_v56 = vmul.f32 %v1208_v8, %v1201_v25 }
 0x1d9   : > { %1212 = vrot.lane.b32.xlu0 %v1210_v56, %s2188_s28 }
 0x24b   : > { %v1213_v57 = vpop.permute.xlu0 %1212 }
 0x24c   : > { %v2876_v13 = vadd.f32 %v1213_v57, %v1205_v52 }
 0x24e   : > { %1943 = vtanh.f32 %v2876_v13 }
 0x254   : > { %v1944_v28 = vpop.eup %1943 }
 0x255   : > { %1218 = vrot.lane.b32.xlu1 %v1944_v28, %s2187_s7 }
 0x2c7   : > { %v1219_v43 = vpop.permute.xlu1 %1218 }
 0x2c8   : > { %v1221_v7 = vmul.f32 %v1219_v43, %v1201_v25  ;;  %v1519_v43 = vsub.f32 %v1463_v3, %v1485_v15 }
 0x2ca   : > { %1227 = vrot.lane.b32.xlu1 %v1221_v7, %s2188_s28  ;;  %v1520_v7 = vand.u32 4294901760, %v1519_v43 }
 0x2cc   : > { %v1521_v1 = vsub.f32 %v1519_v43, %v1520_v7 }
 0x2ce   : > { %v1522_v35 = vand.u32 4294901760, %v1521_v1 }
 0x33c   : > { %v2881_v22 = vpop.permute.xlu1 %1227 }
 0x33d   : > { %v1230_v54 = vsel %vm1229_vm5, %v2881_v22, 0 }
 0x33e   : > { %v1252_v21 = vand.u32 4294901760, %v1230_v54 }
 0x340   : > { %v1253_v10 = vsub.f32 %v1230_v54, %v1252_v21  ;;  %1298 = vmatmul.f32.vlgmr.msra.gmra.mxu3 %v1252_v21  ;;  %v1531_v54 = vsub.f32 %v1461_v53, %v1489_v6 }
 0x341   : > { %1584 = vmatpush.msra.mxu3 %v1483_v33 }
 0x342   : > { %v1254_v20 = vand.u32 4294901760, %v1253_v10  ;;  %1328 = vmatmul.f32.vlgmr.msrb.gmra.mxu0 %v1253_v10 }
 0x343   : > { %1586 = vmatpush.msra.mxu3 %v1485_v15 }
 0x344   : > { %v1255_v26 = vsub.f32 %v1253_v10, %v1254_v20  ;;  %1355 = vmatmul.f32.vlgmr.msrb.gmra.mxu1 %v1254_v20  ;;  %v1532_v10 = vand.u32 4294901760, %v1531_v54 }
 0x345   : > { %1588 = vmatpush.msra.mxu3 %v1487_v23 }
 0x346   : > { %v1256_v2 = vand.u32 4294901760, %v1255_v26  ;;  %v1533_v26 = vsub.f32 %v1531_v54, %v1532_v10 }
 0x347   : > { %1590 = vmatpush.msra.mxu3 %v1489_v6 }
 0x348   : > { %1257 = vmatmul.f32.vlgmr.msra.gmra.mxu2 %v1256_v2  ;;  %1413 = vmatmul.f32.vlgmr.msrb.gmra.mxu3 %v1252_v21  ;;  %v1534_v2 = vand.u32 4294901760, %v1533_v26 }
 0x349   : > { %1555 = vmatpush.msra.mxu2 %v1513_v49 }
 0x34b   : > { %1558 = vmatpush.msra.mxu2 %v1519_v43 }
 0x34d   : > { %1561 = vmatpush.msra.mxu2 %v1525_v12 }
 0x34f   : > { %1564 = vmatpush.msra.mxu2 %v1531_v54 }
 0x350   : > { %1388 = vmatmul.f32.vlgmr.msrb.gmra.mxu2 %v1252_v21  ;;  %v1527_v21 = vsub.f32 %v1525_v12, %v1526_v63 }
 0x352   : > { %v1528_v20 = vand.u32 4294901760, %v1527_v21 }
 0x3bf   : > { %v1329_v5 = vpop.f32.mrf.mxu0 }
 0x3c1   : > { %v1356_v40 = vpop.f32.mrf.mxu1 }
 0x3c3   : > { %v1299_v41 = vpop.f32.mrf.mxu3 }
 0x3cb   : > { %v1258_v11 = vpop.f32.mrf.mxu2  ;;  %v1414_v58 = vpop.f32.mrf.mxu3 }
 0x3cc   : > { %v1259_v27 = vadd.f32 %v1258_v11, %v2871_v18 }
 0x3ce   : > { %v1300_v29 = vadd.f32 %v1299_v41, %v1259_v27 }
 0x3d0   : > { %v1330_v36 = vadd.f32 %v1329_v5, %v1300_v29 }
 0x3d2   : > { %v1357_v60 = vadd.f32 %v1356_v40, %v1330_v36 }
 0x3d3   : > { %v1389_v50 = vpop.f32.mrf.mxu2 }
 0x3d4   : > { %v1390_v42 = vadd.f32 %v1389_v50, %v1357_v60  ;;  %v1672_v60 = vsel %vm1229_vm5, %v2881_v22, %v2876_v13  ;;  %v1937_v22 = vld [vmem:[#allocation11 + $0x3] ss:$0 sm:$0xff] }
 0x3d6   : > { %v1415_v0 = vadd.f32 %v1414_v58, %v1390_v42 }
 0x3d8   : > { %v1418_v44 = vadd.f32 %v1935_v51, %v1415_v0  ;;  %v1936_v0 = vld [vmem:[#allocation11 + $0x2] ss:$0 sm:$0xff] }
 0x3da   : > { %v1829_v19 = vmul.f32 -1.442695, %v1418_v44 }
 0x3dc   : > { %1945 = vpow2.f32 %v1829_v19 }
 0x3e2   : > { %v1946_v9 = vpop.eup %1945 }
 0x3e3   : > { %v1422_v59 = vadd.f32 1.0, %v1946_v9 }
 0x3e5   : > { %1947 = vrcp.f32 %v1422_v59  ;;  %v1434_v18 = vand.u32 2147483648, %v1422_v59  ;;  %v1432_v55 = vand.u32 2147483647, %v1422_v59  ;;  %vm1428_vm7 = vweird.f32 %v1422_v59 }
 0x3e7   : > { %v1435_v8 = vor.u32 1.1754944e-38, %v1434_v18  ;;  %vm1433_vm9 = vcmp.eq.f32.partialorder %v1432_v55, 8.507059e+37 }
 0x3eb   : > { %v1948_v32 = vpop.eup %1947 }
 0x3ec   : > { %v1424_v34 = vmul.f32 %v1948_v32, %v1422_v59  ;;  %vm1429_vm6 = vweird.f32 %v1948_v32 }
 0x3ed   : > { %vm1430_vm8 = vmor %vm1428_vm7, %vm1429_vm6 }
 0x3ee   : > { %v1425_v39 = vsub.f32 1.0, %v1424_v34 }
 0x3f0   : > { %v1426_v25 = vmul.f32 %v1948_v32, %v1425_v39 }
 0x3f2   : > { %v1427_v24 = vadd.f32 %v1948_v32, %v1426_v25 }
 0x3f4   : > { %v1431_v56 = vsel %vm1430_vm8, %v1948_v32, %v1427_v24 }
 0x3f5   : > { %v1436_v52 = vsel %vm1433_vm9, %v1435_v8, %v1431_v56 }
 0x3f6   : > { %v1438_v57 = vmul.f32 2.0, %v1436_v52 }
 0x3f8   : > { %v1830_v28 = vadd.f32 -1.0, %v1438_v57  ;;  %v2190_v57 = vmov 0  }
 0x3f9   : > { %1932 = vset.pattern.permute.xlu1 %v2190_v57  ;;  %1933 = vset.pattern.permute.xlu0 %v2190_v57 }
 0x3fa   : > { %1446 = vrot.lane.b32.xlu2 %v1830_v28, %s2187_s7  ;;  %v1938_v28 = vld [vmem:[#allocation11 + $0x4] ss:$0 sm:$0xff] }
 0x402   : > { %1441 = vrot.lane.b32.xlu2 %v2651_v17, %s2187_s7  ;;  %v1514_v17 = vand.u32 4294901760, %v1513_v49 }
 0x404   : > { %v1515_v4 = vsub.f32 %v1513_v49, %v1514_v17  ;;  %1613 = vmatpush.msrb.mxu0 %v1514_v17 }
 0x406   : > { %v1516_v16 = vand.u32 4294901760, %v1515_v4  ;;  %1617 = vmatpush.msrb.mxu0 %v1520_v7 }
 0x408   : > { %1517 = vmatpush.msra.mxu1 %v1516_v16  ;;  %1621 = vmatpush.msrb.mxu0 %v1526_v63 }
 0x40a   : > { %1523 = vmatpush.msra.mxu1 %v1522_v35  ;;  %1625 = vmatpush.msrb.mxu0 %v1532_v10 }
 0x40c   : > { %1529 = vmatpush.msra.mxu1 %v1528_v20 }
 0x40e   : > { %1535 = vmatpush.msra.mxu1 %v1534_v2 }
 0x410   : > { %1644 = vmatpush.msrb.mxu1 %v1483_v33 }
 0x412   : > { %1646 = vmatpush.msrb.mxu1 %v1485_v15 }
 0x414   : > { %1648 = vmatpush.msrb.mxu1 %v1487_v23 }
 0x416   : > { %1650 = vmatpush.msrb.mxu1 %v1489_v6 }
 0x454   : > { %v1447_v38 = vpop.permute.xlu2 %1446 }
 0x455   : > { %v1449_v61 = vmul.f32 %v1447_v38, %v1436_v52 }
 0x457   : > { %1451 = vrot.lane.b32.xlu0 %v1449_v61, %s2188_s28 }
 0x45c   : > { %v1442_v31 = vpop.permute.xlu2 %1441 }
 0x45d   : > { %v1444_v14 = vmul.f32 %v1442_v31, %v1436_v52 }
 0x4c9   : > { %v1452_v37 = vpop.permute.xlu0 %1451 }
 0x4ca   : > { %v1454_v46 = vadd.f32 %v1452_v37, %v1444_v14 }
 0x4cc   : > { %1949 = vtanh.f32 %v1454_v46 }
 0x4d2   : > { %v1950_v45 = vpop.eup %1949 }
 0x4d3   : > { %1457 = vrot.lane.b32.xlu1 %v1950_v45, %s2187_s7 }
 0x545   : > { %v1458_v62 = vpop.permute.xlu1 %1457 }
 0x546   : > { %v1460_v47 = vmul.f32 %v1458_v62, %v1436_v52 }
 0x548   : > { %1665 = vrot.lane.b32.xlu1 %v1460_v47, %s2189_s29  ;;  %1467 = vrot.lane.b32.xlu2 %v1460_v47, %s2188_s28 }
 0x550   : > { %1669 = vrot.lane.b32.xlu2 %v1454_v46, %s2187_s7 }
 0x5a2   : > { %v1468_v41 = vpop.permute.xlu2 %1467 }
 0x5a3   : > { %v1469_v11 = vsel %vm1229_vm5, %v1468_v41, 0 }
 0x5a4   : > { %v1491_v27 = vand.u32 4294901760, %v1469_v11 }
 0x5a6   : > { %v1492_v29 = vsub.f32 %v1469_v11, %v1491_v27  ;;  %1537 = vmatmul.f32.vlgmr.msra.gmra.mxu1 %v1491_v27 }
 0x5a8   : > { %v1493_v5 = vand.u32 4294901760, %v1492_v29  ;;  %1567 = vmatmul.f32.vlgmr.msra.gmra.mxu2 %v1492_v29 }
 0x5aa   : > { %v1494_v36 = vsub.f32 %v1492_v29, %v1493_v5  ;;  %1594 = vmatmul.f32.vlgmr.msra.gmra.mxu3 %v1493_v5  ;;  %v1670_v42 = vpop.permute.xlu2 %1669 }
 0x5ac   : > { %v1495_v40 = vand.u32 4294901760, %v1494_v36 }
 0x5ae   : > { %1496 = vmatmul.f32.vlgmr.msra.gmra.mxu0 %v1495_v40  ;;  %1652 = vmatmul.f32.vlgmr.msrb.gmra.mxu1 %v1491_v27 }
 0x5b6   : > { %1627 = vmatmul.f32.vlgmr.msrb.gmra.mxu0 %v1491_v27 }
 0x5ba   : > { %v1666_v50 = vpop.permute.xlu1 %1665 }
 0x5bb   : > { %v1674_v51 = vsel %vm1673_vm10, %v1672_v60, %v1666_v50 }
 0x5bc   : > { %v1676_v58 = vsel %vm1675_vm11, %v1674_v51, %v1670_v42 }
 0x5bd   : > { %1677 = vst [vmem:[#allocation2] sm:$0xff] %v1676_v58 }
 0x5be   : > { %1683 = vst [vmem:[%s2358_s27] sm:$0xff] %v1676_v58 }
 0x623   : > { %v1538_v44 = vpop.f32.mrf.mxu1 }
 0x62b   : > { %v1497_v19 = vpop.f32.mrf.mxu0  ;;  %v1568_v32 = vpop.f32.mrf.mxu2 }
 0x62c   : > { %v1498_v9 = vadd.f32 %v1936_v0, %v1497_v19  ;;  %v1653_v24 = vpop.f32.mrf.mxu1 }
 0x62d   : > { %v1595_v39 = vpop.f32.mrf.mxu3 }
 0x62e   : > { %v1539_v59 = vadd.f32 %v1538_v44, %v1498_v9 }
 0x630   : > { %v1569_v34 = vadd.f32 %v1568_v32, %v1539_v59 }
 0x632   : > { %v1596_v18 = vadd.f32 %v1595_v39, %v1569_v34 }
 0x633   : > { %v1628_v25 = vpop.f32.mrf.mxu0 }
 0x634   : > { %v1629_v55 = vadd.f32 %v1628_v25, %v1596_v18 }
 0x636   : > { %v1654_v13 = vadd.f32 %v1653_v24, %v1629_v55 }
 0x638   : > { %1951 = vtanh.f32 %v1654_v13 }
 0x63e   : > { %v1952_v8 = vpop.eup %1951 }
 0x63f   : > { %v1658_v56 = vmul.f32 %v1952_v8, %v1937_v22 }
 0x641   : > { %v1659_v52 = vsel %vm1229_vm5, %v1658_v56, 0.0 }
 0x642   : > { %1660 = vadd.xlane.f32.xlu0 %v1659_v52 }
 0x6b5   : > { %v1661_v38 = vpop.xlane.xlu0 %1660 }
 0x6b6   : > { %v1663_v61 = vadd.f32 %v1938_v28, %v1661_v38 }
 0x6b8   : > { %1680 = vperm.xlu1 %1932, %v1663_v61  }
 0x72a   : > { %v1681_v31 = vpop.permute.xlu1 %1680 }
 0x72b   : > { %1684 = vst [vmem:[%s2358_s27 + $0x8] sm:$0xff] %v1681_v31 }
 0x72c   : > { %2130 = shalt.err (!%p2127_p10)
}
 0x72d   : > { %1855 = dma.vmem_to_hbm [thread:$0]  (%p2308_p5), %s1700_s17, 256, %s1702_s22, %s1686_s11  }
 0x72e PF: > { %p1887_p13 = scmp.ge.s32.totalorder %s2177_s21, 2  ;;  %s1713_s12 = sand.u32 1, %s2165_s18  }
 0x72f   : > { %s1714_s27 = scalar_lea.sflag [#allocation5], %s1713_s12 }
 0x730   : > { %p1875_p11 = pnand %p1887_p13, %p2312_p6 }
 0x732   : > { %p1876_p0 = pneg %p1875_p11 }
 0x734   : > { %2160 = dma.done.wait (%p1876_p0), %s1714_s27, 256  }
 0x735   : > { %2162 = vsyncadd (%p1876_p0), %s1714_s27, 4294967040  ;;  %p20_p2 = scmp.ge.s32.totalorder %s2282_s6, 10   ;;  %s3002_s18 = smov %s2169_s19 }
 0x736   : > { %s3003_s19 = smov %s2173_s20  ;;  %s3004_s20 = smov %s2293_s10 }
 0x737   : > { %s3005_s21 = smov %s2282_s6  ;;  %22 = sbr.rel (!%p20_p2) target bundleno = 7 (0x7), region = 105 }
 0x73c   :  { %1720 = vsyncpa [#allocation4], 1 }
 0x73d   :  { %1722 = vsyncpa [#allocation4 + $0x1], 1 }
 0x73e   :  { %1723 = vsyncpa [#allocation7], 1 }
 0x73f   :  { %1724 = vsyncpa [#allocation10], 1 }
 0x740   :  { %1725 = vsyncpa [#allocation5], 1 }
 0x741   :  { %1727 = vsyncpa [#allocation5 + $0x1], 1 }

</bundles_post_ra>
